<compile_context>
chip_gen: v6e
topology: v6e:2x2x1
jax: 0.10.0
libtpu: 0.0.40
codegen_flags: <defaults>
</compile_context>

<pallas_src>
import math

import jax
import jax.numpy as jnp
from jax.experimental import pallas as pl
from jax.experimental.pallas import tpu as pltpu


_TARGET_TILE_BYTES = 4 << 20       # ~4 MiB per stream buffer
_VMEM_LIMIT_BYTES = 48 << 20       # 5 streams x 2 bufs x 4 MiB = 40 MiB (+slack)
_MIN_PALLAS_ELEMENTS = 256 * 1024  # below this, a plain XLA fusion is faster


def _fusion_kernel(vis1_ref, vis2_ref, ir1_ref, ir2_ref, out_ref):
    vis = jnp.maximum(vis1_ref[...], vis2_ref[...])
    ir = jnp.maximum(ir1_ref[...], ir2_ref[...])
    out_ref[...] = (vis + ir) * 0.5


def _fusion_jnp(vis1, vis2, ir1, ir2):
    # Reference semantics of Fusion_method.max_fc (used for tiny / integer
    # inputs and for the <128-element misaligned tail).
    return (jnp.maximum(vis1, vis2) + jnp.maximum(ir1, ir2)) / 2


def _fusion_pallas_2d(v1, v2, i1, i2, *, sublane_pack):
    rows, lanes = v1.shape
    dtype = v1.dtype
    itemsize = jnp.dtype(dtype).itemsize

    # Tile rows: as many as fit the ~4 MiB target, rounded to sublane packing.
    tr_cap = max(
        sublane_pack,
        (_TARGET_TILE_BYTES // (lanes * itemsize)) // sublane_pack * sublane_pack,
    )
    # Guarantee >= 2 (and even) grid steps so the "parallel" axis can be split
    # across v7x's two TensorCores even for inputs that fit in one tile.
    n_blocks = max(2, pl.cdiv(rows, tr_cap))
    if n_blocks % 2:
        n_blocks += 1
    tr = min(tr_cap, pl.cdiv(pl.cdiv(rows, n_blocks), sublane_pack) * sublane_pack)
    tr = max(sublane_pack, tr)
    grid_len = pl.cdiv(rows, tr)  # final block may be partial -> Pallas masks it

    spec = pl.BlockSpec((tr, lanes), lambda r: (r, 0))

    return pl.pallas_call(
        _fusion_kernel,
        out_shape=jax.ShapeDtypeStruct((rows, lanes), dtype),
        grid_spec=pltpu.PrefetchScalarGridSpec(
            num_scalar_prefetch=0,
            grid=(grid_len,),
            in_specs=[spec, spec, spec, spec],
            out_specs=spec,
        ),
        compiler_params=pltpu.CompilerParams(
            dimension_semantics=("parallel",),
            vmem_limit_bytes=_VMEM_LIMIT_BYTES,
        ),
    )(v1, v2, i1, i2)


def fusion_method(vis1, vis2, ir1, ir2, *, force_pallas=False):
    """Elementwise max-fusion of two visible and two infrared feature maps."""
    assert vis1.shape == vis2.shape == ir1.shape == ir2.shape
    assert vis1.dtype == vis2.dtype == ir1.dtype == ir2.dtype
    orig_shape = vis1.shape
    dtype = vis1.dtype
    total = math.prod(orig_shape)

    # Fast paths: integer dtypes (the "/2" promotes to float, like torch) and
    # tiny inputs (pallas launch + wrapper reshapes dominate).
    if (
        total == 0
        or not jnp.issubdtype(dtype, jnp.floating)
        or (total < _MIN_PALLAS_ELEMENTS and not force_pallas)
    ):
        return _fusion_jnp(vis1, vis2, ir1, ir2)

    itemsize = jnp.dtype(dtype).itemsize
    # dtype-aware sublane packing: 8 rows/vreg f32, 16 bf16, 32 fp8.
    sublane_pack = max(8, 32 // itemsize)

    # Pick the widest lane-dense last dim that divides the flat length so the
    # reshape is a free bitcast (no jnp.pad, no output slice) on the hot path.
    if total % 512 == 0:
        lanes = 512
    elif total % 256 == 0:
        lanes = 256
    else:
        lanes = 128

    main_total = (total // lanes) * lanes
    tail_len = total - main_total

    flats = [x.reshape(-1) for x in (vis1, vis2, ir1, ir2)]

    if tail_len == 0:
        mains = [f.reshape(main_total // lanes, lanes) for f in flats]
        out2d = _fusion_pallas_2d(*mains, sublane_pack=sublane_pack)
        return out2d.reshape(orig_shape)

    if main_total == 0:  # whole input is smaller than one lane row
        return _fusion_jnp(vis1, vis2, ir1, ir2)

    # Misaligned flat length: kernel on the 128-aligned prefix, plain jnp on
    # the (<128-element) tail, then stitch the flat result back together.
    mains = [f[:main_total].reshape(main_total // lanes, lanes) for f in flats]
    tails = [f[main_total:] for f in flats]
    out_main = _fusion_pallas_2d(*mains, sublane_pack=sublane_pack).reshape(-1)
    out_tail = _fusion_jnp(*tails).astype(dtype)
    return jnp.concatenate([out_main, out_tail]).reshape(orig_shape)


if __name__ == "__main__":
    key = jax.random.PRNGKey(0)

    def _make(shape, k):
        ks = jax.random.split(k, 4)
        return [jax.random.normal(kk, shape, dtype=jnp.float32) for kk in ks]

    def _ref(a, b, c, d):
        return (jnp.maximum(a, b) + jnp.maximum(c, d)) / 2.0

    # 1) Spec-sized conv-feature input (2, 4, 16, 16): tiny -> XLA fast path.
    shape_small = (2, 4, 16, 16)
    xs = _make(shape_small, jax.random.fold_in(key, 0))
    out = jax.block_until_ready(fusion_method(*xs))
    assert out.shape == shape_small and out.dtype == jnp.float32
    assert jnp.allclose(out, _ref(*xs), atol=1e-6, rtol=1e-6)

    # 2) Large enough to take the Pallas path (lane-aligned, grid of 2).
    shape_big = (2, 64, 32, 64)  # 262144 elements
    ys = _make(shape_big, jax.random.fold_in(key, 1))
    out_big = jax.block_until_ready(fusion_method(*ys))
    assert out_big.shape == shape_big
    assert jnp.allclose(out_big, _ref(*ys), atol=1e-6, rtol=1e-6)

    # 3) Misaligned flat length, forced through the Pallas path
    #    (exercises the partial final row-block and the <128-element tail).
    shape_odd = (3, 5, 7, 11)  # 1155 elements = 9 * 128 + 3
    zs = _make(shape_odd, jax.random.fold_in(key, 2))
    out_odd = jax.block_until_ready(fusion_method(*zs, force_pallas=True))
    assert out_odd.shape == shape_odd
    assert jnp.allclose(out_odd, _ref(*zs), atol=1e-6, rtol=1e-6)

    print("KERNEL_OK")
</pallas_src>

<mosaic_0001>
module attributes {stable_mosaic.version = 11 : i64} {
  func.func @_fusion_kernel(%arg0: i32, %arg1: memref<256x512xf32, #tpu.memory_space<vmem>>, %arg2: memref<256x512xf32, #tpu.memory_space<vmem>>, %arg3: memref<256x512xf32, #tpu.memory_space<vmem>>, %arg4: memref<256x512xf32, #tpu.memory_space<vmem>>, %arg5: memref<256x512xf32, #tpu.memory_space<vmem>>) attributes {dimension_semantics = [#tpu.dimension_semantics<parallel>], iteration_bounds = array<i64: 2>, scalar_prefetch = 0 : i64, scratch_operands = 0 : i64, tpu.core_type = #tpu.core_type<tc>, window_params = [{transform_indices = @transform_0, window_bounds = array<i64: 256, 512>}, {transform_indices = @transform_1, window_bounds = array<i64: 256, 512>}, {transform_indices = @transform_2, window_bounds = array<i64: 256, 512>}, {transform_indices = @transform_3, window_bounds = array<i64: 256, 512>}, {transform_indices = @transform_4, window_bounds = array<i64: 256, 512>}]} {
    %c0 = arith.constant 0 : index
    %c0_0 = arith.constant 0 : index
    %0 = vector.load %arg1[%c0, %c0_0] : memref<256x512xf32, #tpu.memory_space<vmem>>, vector<256x512xf32>
    %c0_1 = arith.constant 0 : index
    %c0_2 = arith.constant 0 : index
    %1 = vector.load %arg2[%c0_1, %c0_2] : memref<256x512xf32, #tpu.memory_space<vmem>>, vector<256x512xf32>
    %2 = arith.maximumf %0, %1 : vector<256x512xf32>
    %c0_3 = arith.constant 0 : index
    %c0_4 = arith.constant 0 : index
    %3 = vector.load %arg3[%c0_3, %c0_4] : memref<256x512xf32, #tpu.memory_space<vmem>>, vector<256x512xf32>
    %c0_5 = arith.constant 0 : index
    %c0_6 = arith.constant 0 : index
    %4 = vector.load %arg4[%c0_5, %c0_6] : memref<256x512xf32, #tpu.memory_space<vmem>>, vector<256x512xf32>
    %5 = arith.maximumf %3, %4 : vector<256x512xf32>
    %6 = arith.addf %2, %5 : vector<256x512xf32>
    %cst = arith.constant 5.000000e-01 : f32
    %7 = vector.broadcast %cst : f32 to vector<256x512xf32>
    %8 = arith.mulf %6, %7 : vector<256x512xf32>
    %c0_7 = arith.constant 0 : index
    %c0_8 = arith.constant 0 : index
    %9 = vector.load %arg5[%c0_7, %c0_8] : memref<256x512xf32, #tpu.memory_space<vmem>>, vector<256x512xf32>
    tpu.vector_store %arg5[%c0_7, %c0_8], %8 {strides = array<i32>} : memref<256x512xf32, #tpu.memory_space<vmem>>, vector<256x512xf32>,
    return
  }
  func.func @transform_0(%arg0: i32) -> (i32, i32) {
    %c0_i32 = arith.constant 0 : i32
    %c0_i32_0 = arith.constant 0 : i32
    return %arg0, %c0_i32 : i32, i32
  }
  func.func @transform_1(%arg0: i32) -> (i32, i32) {
    %c0_i32 = arith.constant 0 : i32
    %c0_i32_0 = arith.constant 0 : i32
    return %arg0, %c0_i32 : i32, i32
  }
  func.func @transform_2(%arg0: i32) -> (i32, i32) {
    %c0_i32 = arith.constant 0 : i32
    %c0_i32_0 = arith.constant 0 : i32
    return %arg0, %c0_i32 : i32, i32
  }
  func.func @transform_3(%arg0: i32) -> (i32, i32) {
    %c0_i32 = arith.constant 0 : i32
    %c0_i32_0 = arith.constant 0 : i32
    return %arg0, %c0_i32 : i32, i32
  }
  func.func @transform_4(%arg0: i32) -> (i32, i32) {
    %c0_i32 = arith.constant 0 : i32
    %c0_i32_0 = arith.constant 0 : i32
    return %arg0, %c0_i32 : i32, i32
  }
}

</mosaic_0001>

<bundles_post_ra>
// kernel: tpu_custom_call.1
= control target key start
LH: loop header
LB: loop body
LE: loop exit
PB: predicated region body
PF: predicated region fallthrough
CT: control target
= control target key end

     0   :  { %s2912_s0 = inlined_call_operand.hbm [shape: f32[512,512], index: 0, kind: input, shape index: {}]   ;;  %s2913_s1 = inlined_call_operand.hbm [shape: f32[512,512], index: 1, kind: input, shape index: {}]   ;;  %s2914_s2 = inlined_call_operand.hbm [shape: f32[512,512], index: 2, kind: input, shape index: {}]   ;;  %s2915_s3 = inlined_call_operand.hbm [shape: f32[512,512], index: 3, kind: input, shape index: {}]   ;;  %s2916_s4 = inlined_call_operand.hbm [shape: f32[512,512], index: 4, kind: output, shape index: {}]  }
   0x1   :  { %2926 = sst [smem:[#allocation18_spill]] %s2912_s0 }
   0x2   :  { %2927 = sst [smem:[#allocation19_spill]] %s2913_s1 }
   0x3   :  { %9 = vsyncpa [#allocation3], 0 }
   0x4   :  { %11 = vsyncpa [#allocation3 + $0x1], 0 }
   0x5   :  { %12 = vsyncpa [#allocation6], 0 }
   0x6   :  { %14 = vsyncpa [#allocation6 + $0x1], 0 }
   0x7   :  { %15 = vsyncpa [#allocation9], 0 }
   0x8   :  { %17 = vsyncpa [#allocation9 + $0x1], 0 }
   0x9   :  { %18 = vsyncpa [#allocation4], 0 }
   0xa   :  { %20 = vsyncpa [#allocation4 + $0x1], 0  ;;  %s1974_s15 = smov 0   ;;  %s1976_s16 = smov 0  }
   0xb   :  { %s1978_s17 = smov 0   ;;  %s1980_s18 = smov 0  }
   0xc LB: > { %2928 = sst [smem:[#allocation15_spill]] %s1934_s17  ;;  %s1995_s19 = sadd.s32 4294967295, %s1938_s18   ;;  %s1938_s18 = sphi %s1980_s18, %s2947_s18   ;;  %s1934_s17 = sphi %s1978_s17, %s2949_s17   ;;  %s1930_s16 = sphi %s1976_s16, %s2951_s16   ;;  %s1926_s15 = sphi %s1974_s15, %s2950_s15  }
   0xd   : > { %s1648_s20 = sadd.s32 4294967294, %s1938_s18   ;;  %s1999_s21 = sadd.s32 1, %s1938_s18  }
   0xe   : > { %2929 = sst [smem:[#allocation16_spill]] %s1999_s21  ;;  %s33_s22 = sadd.s32 1, %s1934_s17 }
   0xf   : > { %s30_s23 = ssub.s32 %s1938_s18, %s1999_s21  ;;  %p40_p0 = scmp.ne.s32.totalorder %s1934_s17, %s1930_s16 }
  0x10   : > { %p31_p1 = scmp.eq.s32.totalorder %s30_s23, 0  ;;  %p41_p2 = scmp.eq.s32.totalorder %s1938_s18, 0 }
  0x11   : > { %p46_p3 = scmp.ne.s32.totalorder %s1930_s16, %s1926_s15  ;;  %p47_p4 = scmp.eq.s32.totalorder %s1995_s19, 0 }
  0x12   : > { %s2011_s24 = scalar_select %p31_p1, %s1934_s17, %s33_s22  }
  0x13   : > { %p42_p5 = por %p41_p2, %p40_p0  ;;  %p2013_p6 = por %p47_p4, %p46_p3 }
  0x14   : > { %2930 = sst [smem:[#allocation17_spill]] %s2011_s24  ;;  %p148_p7 = scmp.eq.s32.totalorder %s1995_s19, 1 }
  0x15   : > { %s2931_s25 = scalar_select %p2013_p6, 1, 0 }
  0x16   : > { %p154_p8 = scmp.eq.s32.totalorder %s1648_s20, 1  ;;  %p1716_p10 = scmp.lt.s32.totalorder %s1938_s18, 2 }
  0x17   : > { %p2020_p11 = por %p148_p7, %p40_p0  ;;  %s2029_s28 = sand.u32 1, %s1934_s17  }
  0x18   : > { %p2024_p12 = por %p154_p8, %p46_p3  ;;  %s2032_s29 = sshll.u32 %s1938_s18, 14 }
  0x19   : > { %s2932_s26 = scalar_select %p2020_p11, 1, 0 }
  0x1a   : > { %s2933_s27 = scalar_select %p2024_p12, 1, 0 }
  0x1b   : > { %s2035_s30 = sshll.u32 %s2029_s28, 10  ;;  %p2037_p13 = pnand %p1716_p10, %p42_p5 }
  0x1c   : > { %s196_s6 = sand.u32 1, %s1938_s18   ;;  %s2935_s1 = sld [smem:[#allocation19_spill]] }
  0x1d   : > { %s200_s10 = scalar_lea.vmem [#allocation5], %s2035_s30  ;;  %s2052_s12 = scalar_lea.sflag [#allocation6], %s196_s6 }
  0x1e   : > { %s208_s11 = sshll.u32 %s200_s10, 4  ;;  %p2058_p2 = pneg %p2037_p13  ;;  %s2049_s11 = int_to_ptr.vmem [resolvable:$true] %s208_s11 }
  0x22   : > { %s2046_s9 = scalar_lea.hbm %s2935_s1, %s2032_s29  ;;  %s1759_s23 = scalar_lea.hbm %s2935_s1, 32768 }
  0x23   : > { %s1754_s13 = scalar_lea.hbm %s2046_s9, 16384  ;;  %p1760_p5 = scmp.lt.s32.totalorder %s2046_s9, %s2935_s1 }
  0x24   : > { %p1755_p1 = scmp.ne.s32.totalorder %s2046_s9, %s1754_s13  ;;  %p1761_p7 = scmp.lt.s32.totalorder %s1759_s23, %s1754_s13 }
  0x26   : > { %p1757_p3 = pnand %p2058_p2, %p1755_p1  ;;  %p1762_p8 = por %p1761_p7, %p1760_p5 }
  0x28   : > { %p1758_p4 = pneg %p1757_p3 }
  0x2a   : > { %p1763_p10 = pnand %p1762_p8, %p1758_p4 }
  0x2c   : > { %1766 = shalt.err (!%p1763_p10)
}
  0x2d   : > { %s1767_s6 = scalar_lea.vmem %s2049_s11, 16384  ;;  %s1940_s10 = smov [#allocation5]  }
  0x2e   : > { %p1768_p9 = scmp.ne.s32.totalorder %s2049_s11, %s1767_s6  ;;  %s1772_s20 = sshll.u32 %s1940_s10, 4  ;;  %s1773_s20 = int_to_ptr.vmem [resolvable:$false] %s1772_s20 }
  0x2f   : > { %s1774_s22 = scalar_lea.vmem %s1773_s20, 32768  ;;  %p1775_p0 = scmp.lt.s32.totalorder %s2049_s11, %s1773_s20 }
  0x30   : > { %p1770_p1 = pnand %p1768_p9, %p2058_p2  ;;  %p1776_p12 = scmp.lt.s32.totalorder %s1774_s22, %s1767_s6 }
  0x32   : > { %p1771_p3 = pneg %p1770_p1  ;;  %p1777_p11 = por %p1776_p12, %p1775_p0 }
  0x34   : > { %p1778_p6 = pnand %p1777_p11, %p1771_p3 }
  0x36   : > { %1781 = shalt.err (!%p1778_p6)
}
  0x37   : > { %s2919_s13 = smov 512   ;;  %s2921_s23 = smov 32  }
  0x38   : > { %1705 = dma.hbm_to_vmem [thread:$0]  (!%p2037_p13), %s2046_s9, 16384, %s2049_s11, %s2052_s12, %s2919_s13, %s2919_s13, %s2921_s23  }
  0x39   : > { %p260_p9 = scmp.lt.s32.totalorder %s1938_s18, 3  ;;  %s2937_s0 = sld [smem:[#allocation18_spill]] }
  0x3a   : > { %p2938_p6 = scmp.ge.s32.totalorder %s1938_s18, 1  ;;  %s178_s20 = scalar_lea.vmem [#allocation2], %s2035_s30 }
  0x3b   : > { %s186_s22 = sshll.u32 %s178_s20, 4  ;;  %s175_s1 = scalar_lea.sflag [#allocation3], %s2029_s28  ;;  %s2098_s22 = int_to_ptr.vmem [resolvable:$true] %s186_s22 }
  0x3c   : > { %p2093_p11 = pnand %p2938_p6, %p260_p9 }
  0x3e   : > { %s2939_s10 = scalar_select %p2093_p11, 1, 0 }
  0x3f   : > { %s2089_s6 = scalar_lea.hbm %s2937_s0, %s2032_s29  ;;  %s1787_s8 = scalar_lea.hbm %s2937_s0, 32768 }
  0x40   : > { %s1782_s9 = scalar_lea.hbm %s2089_s6, 16384  ;;  %p1788_p5 = scmp.lt.s32.totalorder %s2089_s6, %s2937_s0 }
  0x41   : > { %p1783_p12 = scmp.ne.s32.totalorder %s2089_s6, %s1782_s9  ;;  %p1789_p7 = scmp.lt.s32.totalorder %s1787_s8, %s1782_s9 }
  0x43   : > { %p1785_p0 = pnand %p1783_p12, %p2058_p2  ;;  %p1790_p8 = por %p1789_p7, %p1788_p5 }
  0x45   : > { %p1786_p4 = pneg %p1785_p0 }
  0x47   : > { %p1791_p10 = pnand %p1790_p8, %p1786_p4 }
  0x49   : > { %1794 = shalt.err (!%p1791_p10)
}
  0x4a   : > { %s1795_s20 = scalar_lea.vmem %s2098_s22, 16384  ;;  %s1943_s24 = smov [#allocation2]  }
  0x4b   : > { %p1796_p1 = scmp.ne.s32.totalorder %s2098_s22, %s1795_s20  ;;  %s1800_s11 = sshll.u32 %s1943_s24, 4  ;;  %s1801_s11 = int_to_ptr.vmem [resolvable:$false] %s1800_s11 }
  0x4c   : > { %s1802_s7 = scalar_lea.vmem %s1801_s11, 32768  ;;  %p1803_p6 = scmp.lt.s32.totalorder %s2098_s22, %s1801_s11 }
  0x4d   : > { %p1798_p3 = pnand %p1796_p1, %p2058_p2  ;;  %p1804_p12 = scmp.lt.s32.totalorder %s1802_s7, %s1795_s20 }
  0x4f   : > { %p1799_p9 = pneg %p1798_p3  ;;  %p1805_p0 = por %p1804_p12, %p1803_p6 }
  0x51   : > { %p1806_p11 = pnand %p1805_p0, %p1799_p9 }
  0x53   : > { %1809 = shalt.err (!%p1806_p11)
}
  0x54   : > { %s2940_s13 = smov 32   ;;  %s2941_s23 = smov 512  }
  0x55   : > { %1702 = dma.hbm_to_vmem [thread:$0]  (!%p2037_p13), %s2089_s6, 16384, %s2098_s22, %s175_s1, %s2941_s23, %s2941_s23, %s2940_s13  }
  0x56   : > { %s2128_s8 = scalar_lea.hbm %s2914_s2, %s2032_s29  ;;  %s222_s20 = scalar_lea.vmem [#allocation7], %s2035_s30 }
  0x57   : > { %s230_s11 = sshll.u32 %s222_s20, 4  ;;  %s1810_s7 = scalar_lea.hbm %s2128_s8, 16384  ;;  %s231_s11 = int_to_ptr.vmem [resolvable:$true] %s230_s11 }
  0x58   : > { %p1811_p11 = scmp.ne.s32.totalorder %s2128_s8, %s1810_s7  ;;  %s1815_s1 = scalar_lea.hbm %s2914_s2, 32768 }
  0x59   : > { %p1816_p7 = scmp.lt.s32.totalorder %s2128_s8, %s2914_s2  ;;  %p1817_p8 = scmp.lt.s32.totalorder %s1815_s1, %s1810_s7 }
  0x5a   : > { %p1813_p4 = pnand %p1811_p11, %p2058_p2 }
  0x5b   : > { %p1818_p10 = por %p1817_p8, %p1816_p7 }
  0x5c   : > { %p1814_p5 = pneg %p1813_p4 }
  0x5e   : > { %p1819_p1 = pnand %p1818_p10, %p1814_p5 }
  0x60   : > { %1822 = shalt.err (!%p1819_p1)
}
  0x61   : > { %s1823_s9 = scalar_lea.vmem %s231_s11, 16384  ;;  %s1944_s24 = smov [#allocation7]  }
  0x62   : > { %p1824_p3 = scmp.ne.s32.totalorder %s231_s11, %s1823_s9  ;;  %s1828_s20 = sshll.u32 %s1944_s24, 4  ;;  %s1829_s20 = int_to_ptr.vmem [resolvable:$false] %s1828_s20 }
  0x63   : > { %s1830_s21 = scalar_lea.vmem %s1829_s20, 32768  ;;  %p1831_p12 = scmp.lt.s32.totalorder %s231_s11, %s1829_s20 }
  0x64   : > { %p1826_p9 = pnand %p1824_p3, %p2058_p2  ;;  %p1832_p0 = scmp.lt.s32.totalorder %s1830_s21, %s1823_s9 }
  0x66   : > { %p1827_p6 = pneg %p1826_p9  ;;  %p1833_p11 = por %p1832_p0, %p1831_p12 }
  0x68   : > { %p1834_p4 = pnand %p1833_p11, %p1827_p6 }
  0x6a   : > { %1837 = shalt.err (!%p1834_p4)
}
  0x6b   : > { %1708 = dma.hbm_to_vmem [thread:$0]  (!%p2037_p13), %s2128_s8, 16384, %s231_s11, %s2052_s12, %s2941_s23, %s2941_s23, %s2940_s13  }
  0x6c   : > { %s2155_s7 = scalar_lea.hbm %s2915_s3, %s2032_s29  ;;  %s244_s21 = scalar_lea.vmem [#allocation8], %s2035_s30 }
  0x6d   : > { %s252_s1 = sshll.u32 %s244_s21, 4  ;;  %s241_s6 = scalar_lea.sflag [#allocation9], %s2029_s28  ;;  %s2158_s1 = int_to_ptr.vmem [resolvable:$true] %s252_s1 }
  0x6e   : > { %s1838_s22 = scalar_lea.hbm %s2155_s7, 16384  ;;  %s1843_s8 = scalar_lea.hbm %s2915_s3, 32768 }
  0x6f   : > { %p1839_p5 = scmp.ne.s32.totalorder %s2155_s7, %s1838_s22  ;;  %p1844_p10 = scmp.lt.s32.totalorder %s2155_s7, %s2915_s3 }
  0x70   : > { %p1845_p1 = scmp.lt.s32.totalorder %s1843_s8, %s1838_s22 }
  0x71   : > { %p1841_p7 = pnand %p1839_p5, %p2058_p2 }
  0x72   : > { %p1846_p3 = por %p1845_p1, %p1844_p10 }
  0x73   : > { %p1842_p8 = pneg %p1841_p7 }
  0x75   : > { %p1847_p9 = pnand %p1846_p3, %p1842_p8 }
  0x77   : > { %1850 = shalt.err (!%p1847_p9)
}
  0x78   : > { %s1851_s28 = scalar_lea.vmem %s2158_s1, 16384  ;;  %s1945_s30 = smov [#allocation8]  }
  0x79   : > { %p1852_p6 = scmp.ne.s32.totalorder %s2158_s1, %s1851_s28  ;;  %s1856_s24 = sshll.u32 %s1945_s30, 4  ;;  %s1857_s24 = int_to_ptr.vmem [resolvable:$false] %s1856_s24 }
  0x7a   : > { %s1858_s20 = scalar_lea.vmem %s1857_s24, 32768  ;;  %p1859_p11 = scmp.lt.s32.totalorder %s2158_s1, %s1857_s24 }
  0x7b   : > { %p1854_p12 = pnand %p1852_p6, %p2058_p2  ;;  %p1860_p4 = scmp.lt.s32.totalorder %s1858_s20, %s1851_s28 }
  0x7d   : > { %p1855_p0 = pneg %p1854_p12  ;;  %p1861_p5 = por %p1860_p4, %p1859_p11 }
  0x7f   : > { %p1862_p7 = pnand %p1861_p5, %p1855_p0 }
  0x81   : > { %1865 = shalt.err (!%p1862_p7)
}
  0x82   : > { %1711 = dma.hbm_to_vmem [thread:$0]  (!%p2037_p13), %s2155_s7, 16384, %s2158_s1, %s241_s6, %s2941_s23, %s2941_s23, %s2940_s13  }
  0x83   : > { %p2942_p2 = scmp.ne.s32.totalorder %s2939_s10, 0 }
  0x84   : > { %s2187_s14 = sand.u32 (!%p2942_p2), 1, %s1930_s16   ;;  %p2943_p8 = scmp.ne.s32.totalorder (!%p2942_p2), %s2931_s25, 0 }
  0x85   : > { %264 = sbr.rel (%p2942_p2) target bundleno = 338 (0x152), region = 36  ;;  %s2190_s0 = sshll.u32 (!%p2942_p2), %s2187_s14, 10 }
  0x86   : > { %s267_s17 = scalar_lea.sflag (!%p2942_p2), [#allocation3], %s2187_s14  ;;  %s2194_s5 = scalar_lea.vmem (!%p2942_p2), [#allocation2], %s2190_s0 }
  0x8a   : > { %1909 = dma.done.wait (%p2943_p8), %s267_s17, 16384  }
  0x8b   : > { %1911 = vsyncadd (%p2943_p8), %s267_s17, 4294950912  ;;  %s275_s10 = sand.u32 1, %s1995_s19   ;;  %s2202_s23 = scalar_lea.vmem [#allocation5], %s2190_s0 }
  0x8c   : > { %s276_s13 = scalar_lea.sflag [#allocation6], %s275_s10 }
  0x8d   : > { %1913 = dma.done.wait (%p2943_p8), %s276_s13, 32768  }
  0x8e   : > { %1915 = vsyncadd (%p2943_p8), %s276_s13, 4294934528  ;;  %s2209_s7 = scalar_lea.vmem [#allocation7], %s2190_s0  ;;  %s294_s21 = scalar_lea.sflag [#allocation9], %s2187_s14 }
  0x8f   : > { %s2213_s1 = scalar_lea.vmem [#allocation8], %s2190_s0 }
  0x90   : > { %1917 = dma.done.wait (%p2943_p8), %s294_s21, 16384  }
  0x91   : > { %1919 = vsyncadd (%p2943_p8), %s294_s21, 4294950912  ;;  %v342_v0 = vld [vmem:[%s2194_s5] sm:$0xff]  ;;  %v343_v5 = vld [vmem:[%s2194_s5 + $0x8] sm:$0xff]  ;;  %s2244_s25 = scalar_lea.vmem [#allocation10], %s2190_s0  ;;  %s1688_s6 = sshll.u32 %s1995_s19, 14 }
  0x92   : > { %v470_v1 = vld [vmem:[%s2202_s23] sm:$0xff]  ;;  %v471_v6 = vld [vmem:[%s2202_s23 + $0x8] sm:$0xff]  ;;  %v344_v11 = vld [vmem:[%s2194_s5 + $0x10] sm:$0xff]  ;;  %s1509_s22 = sshll.u32 %s2244_s25, 4  ;;  %s2865_s8 = scalar_lea.hbm %s2916_s4, %s1688_s6  ;;  %s2867_s22 = int_to_ptr.vmem [resolvable:$true] %s1509_s22 }
  0x93   : > { %v726_v2 = vld [vmem:[%s2209_s7] sm:$0xff]  ;;  %v598_v3 = vmax.f32 %v342_v0, %v470_v1  ;;  %v599_v8 = vmax.f32 %v343_v5, %v471_v6  ;;  %v727_v9 = vld [vmem:[%s2209_s7 + $0x8] sm:$0xff]  ;;  %v472_v13 = vld [vmem:[%s2202_s23 + $0x10] sm:$0xff]  ;;  %s1495_s19 = scalar_lea.sflag [#allocation4], %s2187_s14  ;;  %s1866_s11 = scalar_lea.vmem %s2867_s22, 16384 }
  0x94   : > { %v854_v4 = vld [vmem:[%s2213_s1] sm:$0xff]  ;;  %v855_v10 = vld [vmem:[%s2213_s1 + $0x8] sm:$0xff]  ;;  %v728_v14 = vld [vmem:[%s2209_s7 + $0x10] sm:$0xff]  ;;  %v600_v17 = vmax.f32 %v344_v11, %v472_v13  ;;  %p1867_p13 = scmp.ne.s32.totalorder %s2867_s22, %s1866_s11  ;;  %p2944_p10 = scmp.ne.s32.totalorder %s2932_s26, 0 }
  0x95   : > { %v982_v7 = vmax.f32 %v726_v2, %v854_v4  ;;  %v983_v12 = vmax.f32 %v727_v9, %v855_v10  ;;  %v856_v15 = vld [vmem:[%s2213_s1 + $0x10] sm:$0xff]  ;;  %v345_v19 = vld [vmem:[%s2194_s5 + $0x18] sm:$0xff]  ;;  %v346_v25 = vld [vmem:[%s2194_s5 + $0x20] sm:$0xff]  ;;  %s1946_s29 = smov [#allocation10]  }
  0x96   : > { %v984_v18 = vmax.f32 %v728_v14, %v856_v15  ;;  %v473_v20 = vld [vmem:[%s2202_s23 + $0x18] sm:$0xff]  ;;  %v474_v26 = vld [vmem:[%s2202_s23 + $0x20] sm:$0xff]  ;;  %v347_v33 = vld [vmem:[%s2194_s5 + $0x28] sm:$0xff]  ;;  %p1868_p1 = pnand %p1867_p13, %p2944_p10  ;;  %s1870_s28 = sshll.u32 %s1946_s29, 4  ;;  %s1871_s28 = int_to_ptr.vmem [resolvable:$false] %s1870_s28 }
  0x97   : > { %v1110_v16 = vadd.f32 %v982_v7, %v598_v3  ;;  %v729_v21 = vld [vmem:[%s2209_s7 + $0x18] sm:$0xff]  ;;  %v1111_v22 = vadd.f32 %v983_v12, %v599_v8  ;;  %v601_v23 = vmax.f32 %v345_v19, %v473_v20  ;;  %v602_v30 = vmax.f32 %v346_v25, %v474_v26  ;;  %v730_v31 = vld [vmem:[%s2209_s7 + $0x20] sm:$0xff]  ;;  %v475_v36 = vld [vmem:[%s2202_s23 + $0x28] sm:$0xff]  ;;  %s1872_s30 = scalar_lea.vmem %s1871_s28, 32768  ;;  %p1873_p9 = scmp.lt.s32.totalorder %s2867_s22, %s1871_s28 }
  0x98   : > { %v857_v24 = vld [vmem:[%s2213_s1 + $0x18] sm:$0xff]  ;;  %v1112_v28 = vadd.f32 %v984_v18, %v600_v17  ;;  %v858_v32 = vld [vmem:[%s2213_s1 + $0x20] sm:$0xff]  ;;  %v731_v37 = vld [vmem:[%s2209_s7 + $0x28] sm:$0xff]  ;;  %v603_v41 = vmax.f32 %v347_v33, %v475_v36  ;;  %p1869_p3 = pneg %p1868_p1  ;;  %p1874_p6 = scmp.lt.s32.totalorder %s1872_s30, %s1866_s11 }
  0x99   : > { %v1238_v27 = vmul.f32 0.5, %v1110_v16  ;;  %v985_v29 = vmax.f32 %v729_v21, %v857_v24  ;;  %v1239_v34 = vmul.f32 0.5, %v1111_v22  ;;  %v986_v35 = vmax.f32 %v730_v31, %v858_v32  ;;  %v859_v38 = vld [vmem:[%s2213_s1 + $0x28] sm:$0xff]  ;;  %v348_v43 = vld [vmem:[%s2194_s5 + $0x30] sm:$0xff]  ;;  %v349_v49 = vld [vmem:[%s2194_s5 + $0x38] sm:$0xff] }
  0x9a   : > { %v1240_v39 = vmul.f32 0.5, %v1112_v28  ;;  %v987_v42 = vmax.f32 %v731_v37, %v859_v38  ;;  %v476_v44 = vld [vmem:[%s2202_s23 + $0x30] sm:$0xff]  ;;  %v477_v50 = vld [vmem:[%s2202_s23 + $0x38] sm:$0xff]  ;;  %v350_v57 = vld [vmem:[%s2194_s5 + $0x40] sm:$0xff]  ;;  %p1875_p12 = por %p1874_p6, %p1873_p9 }
  0x9b   : > { %1366 = vst [vmem:[%s2244_s25] sm:$0xff] %v1238_v27  ;;  %v1113_v40 = vadd.f32 %v985_v29, %v601_v23  ;;  %v732_v45 = vld [vmem:[%s2209_s7 + $0x30] sm:$0xff]  ;;  %1367 = vst [vmem:[%s2244_s25 + $0x8] sm:$0xff] %v1239_v34  ;;  %v1114_v46 = vadd.f32 %v986_v35, %v602_v30  ;;  %v604_v47 = vmax.f32 %v348_v43, %v476_v44  ;;  %v733_v55 = vld [vmem:[%s2209_s7 + $0x38] sm:$0xff] }
  0x9c   : > { %v860_v48 = vld [vmem:[%s2213_s1 + $0x30] sm:$0xff]  ;;  %1368 = vst [vmem:[%s2244_s25 + $0x10] sm:$0xff] %v1240_v39  ;;  %v1115_v52 = vadd.f32 %v987_v42, %v603_v41  ;;  %v605_v54 = vmax.f32 %v349_v49, %v477_v50  ;;  %v861_v56 = vld [vmem:[%s2213_s1 + $0x38] sm:$0xff]  ;;  %v478_v60 = vld [vmem:[%s2202_s23 + $0x40] sm:$0xff]  ;;  %p1876_p0 = pnand %p1875_p12, %p1869_p3 }
  0x9d   : > { %v1241_v51 = vmul.f32 0.5, %v1113_v40  ;;  %v988_v53 = vmax.f32 %v732_v45, %v860_v48  ;;  %v1242_v58 = vmul.f32 0.5, %v1114_v46  ;;  %v989_v59 = vmax.f32 %v733_v55, %v861_v56  ;;  %v734_v61 = vld [vmem:[%s2209_s7 + $0x40] sm:$0xff]  ;;  %v351_v3 = vld [vmem:[%s2194_s5 + $0x48] sm:$0xff]  ;;  %v352_v9 = vld [vmem:[%s2194_s5 + $0x50] sm:$0xff] }
  0x9e   : > { %v862_v62 = vld [vmem:[%s2213_s1 + $0x40] sm:$0xff]  ;;  %v1243_v63 = vmul.f32 0.5, %v1115_v52  ;;  %v606_v1 = vmax.f32 %v350_v57, %v478_v60  ;;  %v479_v4 = vld [vmem:[%s2202_s23 + $0x48] sm:$0xff]  ;;  %v480_v10 = vld [vmem:[%s2202_s23 + $0x50] sm:$0xff] }
  0x9f   : > { %1369 = vst [vmem:[%s2244_s25 + $0x18] sm:$0xff] %v1241_v51  ;;  %v1116_v0 = vadd.f32 %v988_v53, %v604_v47  ;;  %v990_v2 = vmax.f32 %v734_v61, %v862_v62  ;;  %v735_v5 = vld [vmem:[%s2209_s7 + $0x48] sm:$0xff]  ;;  %1370 = vst [vmem:[%s2244_s25 + $0x20] sm:$0xff] %v1242_v58  ;;  %v1117_v6 = vadd.f32 %v989_v59, %v605_v54  ;;  %v736_v15 = vld [vmem:[%s2209_s7 + $0x50] sm:$0xff] }
  0xa0   : > { %v607_v7 = vmax.f32 %v351_v3, %v479_v4  ;;  %v863_v8 = vld [vmem:[%s2213_s1 + $0x48] sm:$0xff]  ;;  %1371 = vst [vmem:[%s2244_s25 + $0x28] sm:$0xff] %v1243_v63  ;;  %v608_v14 = vmax.f32 %v352_v9, %v480_v10  ;;  %v864_v16 = vld [vmem:[%s2213_s1 + $0x50] sm:$0xff]  ;;  %v353_v17 = vld [vmem:[%s2194_s5 + $0x58] sm:$0xff] }
  0xa1   : > { %v1244_v11 = vmul.f32 0.5, %v1116_v0  ;;  %v1118_v12 = vadd.f32 %v990_v2, %v606_v1  ;;  %v991_v13 = vmax.f32 %v735_v5, %v863_v8  ;;  %v1245_v18 = vmul.f32 0.5, %v1117_v6  ;;  %v481_v20 = vld [vmem:[%s2202_s23 + $0x58] sm:$0xff]  ;;  %v354_v27 = vld [vmem:[%s2194_s5 + $0x60] sm:$0xff]  ;;  %v355_v33 = vld [vmem:[%s2194_s5 + $0x68] sm:$0xff] }
  0xa2   : > { %v992_v19 = vmax.f32 %v736_v15, %v864_v16  ;;  %v737_v21 = vld [vmem:[%s2209_s7 + $0x58] sm:$0xff]  ;;  %v609_v25 = vmax.f32 %v353_v17, %v481_v20  ;;  %v482_v28 = vld [vmem:[%s2202_s23 + $0x60] sm:$0xff]  ;;  %v483_v34 = vld [vmem:[%s2202_s23 + $0x68] sm:$0xff] }
  0xa3   : > { %v865_v22 = vld [vmem:[%s2213_s1 + $0x58] sm:$0xff]  ;;  %1372 = vst [vmem:[%s2244_s25 + $0x30] sm:$0xff] %v1244_v11  ;;  %v1246_v23 = vmul.f32 0.5, %v1118_v12  ;;  %v1119_v24 = vadd.f32 %v991_v13, %v607_v7  ;;  %v738_v29 = vld [vmem:[%s2209_s7 + $0x60] sm:$0xff]  ;;  %1373 = vst [vmem:[%s2244_s25 + $0x38] sm:$0xff] %v1245_v18  ;;  %v610_v31 = vmax.f32 %v354_v27, %v482_v28  ;;  %v611_v38 = vmax.f32 %v355_v33, %v483_v34 }
  0xa4   : > { %v993_v26 = vmax.f32 %v737_v21, %v865_v22  ;;  %v1120_v30 = vadd.f32 %v992_v19, %v608_v14  ;;  %v866_v32 = vld [vmem:[%s2213_s1 + $0x60] sm:$0xff]  ;;  %v739_v39 = vld [vmem:[%s2209_s7 + $0x68] sm:$0xff]  ;;  %v356_v41 = vld [vmem:[%s2194_s5 + $0x70] sm:$0xff] }
  0xa5   : > { %1374 = vst [vmem:[%s2244_s25 + $0x40] sm:$0xff] %v1246_v23  ;;  %v1247_v35 = vmul.f32 0.5, %v1119_v24  ;;  %v994_v37 = vmax.f32 %v738_v29, %v866_v32  ;;  %v867_v40 = vld [vmem:[%s2213_s1 + $0x68] sm:$0xff]  ;;  %v484_v44 = vld [vmem:[%s2202_s23 + $0x70] sm:$0xff]  ;;  %v357_v51 = vld [vmem:[%s2194_s5 + $0x78] sm:$0xff] }
  0xa6   : > { %v1121_v36 = vadd.f32 %v993_v26, %v609_v25  ;;  %v1248_v42 = vmul.f32 0.5, %v1120_v30  ;;  %v995_v43 = vmax.f32 %v739_v39, %v867_v40  ;;  %v740_v45 = vld [vmem:[%s2209_s7 + $0x70] sm:$0xff]  ;;  %v612_v49 = vmax.f32 %v356_v41, %v484_v44  ;;  %v485_v52 = vld [vmem:[%s2202_s23 + $0x78] sm:$0xff]  ;;  %v358_v57 = vld [vmem:[%s2194_s5 + $0x80] sm:$0xff] }
  0xa7   : > { %v868_v46 = vld [vmem:[%s2213_s1 + $0x70] sm:$0xff]  ;;  %1375 = vst [vmem:[%s2244_s25 + $0x48] sm:$0xff] %v1247_v35  ;;  %v1122_v48 = vadd.f32 %v994_v37, %v610_v31  ;;  %v741_v53 = vld [vmem:[%s2209_s7 + $0x78] sm:$0xff]  ;;  %v613_v55 = vmax.f32 %v357_v51, %v485_v52  ;;  %v486_v58 = vld [vmem:[%s2202_s23 + $0x80] sm:$0xff] }
  0xa8   : > { %v1249_v47 = vmul.f32 0.5, %v1121_v36  ;;  %v996_v50 = vmax.f32 %v740_v45, %v868_v46  ;;  %1376 = vst [vmem:[%s2244_s25 + $0x50] sm:$0xff] %v1248_v42  ;;  %v1123_v54 = vadd.f32 %v995_v43, %v611_v38  ;;  %v869_v56 = vld [vmem:[%s2213_s1 + $0x78] sm:$0xff]  ;;  %v614_v62 = vmax.f32 %v358_v57, %v486_v58  ;;  %v742_v63 = vld [vmem:[%s2209_s7 + $0x80] sm:$0xff]  ;;  %v359_v1 = vld [vmem:[%s2194_s5 + $0x88] sm:$0xff] }
  0xa9   : > { %v1250_v59 = vmul.f32 0.5, %v1122_v48  ;;  %v997_v61 = vmax.f32 %v741_v53, %v869_v56  ;;  %v870_v0 = vld [vmem:[%s2213_s1 + $0x80] sm:$0xff]  ;;  %v487_v4 = vld [vmem:[%s2202_s23 + $0x88] sm:$0xff]  ;;  %v360_v11 = vld [vmem:[%s2194_s5 + $0x90] sm:$0xff] }
  0xaa   : > { %1377 = vst [vmem:[%s2244_s25 + $0x58] sm:$0xff] %v1249_v47  ;;  %v1124_v60 = vadd.f32 %v996_v50, %v612_v49  ;;  %v1251_v2 = vmul.f32 0.5, %v1123_v54  ;;  %v998_v3 = vmax.f32 %v742_v63, %v870_v0  ;;  %v743_v5 = vld [vmem:[%s2209_s7 + $0x88] sm:$0xff]  ;;  %v615_v9 = vmax.f32 %v359_v1, %v487_v4  ;;  %v488_v12 = vld [vmem:[%s2202_s23 + $0x90] sm:$0xff]  ;;  %v361_v17 = vld [vmem:[%s2194_s5 + $0x98] sm:$0xff] }
  0xab   : > { %v871_v6 = vld [vmem:[%s2213_s1 + $0x88] sm:$0xff]  ;;  %1378 = vst [vmem:[%s2244_s25 + $0x60] sm:$0xff] %v1250_v59  ;;  %v1125_v8 = vadd.f32 %v997_v61, %v613_v55  ;;  %v744_v13 = vld [vmem:[%s2209_s7 + $0x90] sm:$0xff]  ;;  %v616_v15 = vmax.f32 %v360_v11, %v488_v12  ;;  %v489_v18 = vld [vmem:[%s2202_s23 + $0x98] sm:$0xff] }
  0xac   : > { %v1252_v7 = vmul.f32 0.5, %v1124_v60  ;;  %v999_v10 = vmax.f32 %v743_v5, %v871_v6  ;;  %1379 = vst [vmem:[%s2244_s25 + $0x68] sm:$0xff] %v1251_v2  ;;  %v1126_v14 = vadd.f32 %v998_v3, %v614_v62  ;;  %v872_v16 = vld [vmem:[%s2213_s1 + $0x90] sm:$0xff]  ;;  %v617_v22 = vmax.f32 %v361_v17, %v489_v18  ;;  %v745_v23 = vld [vmem:[%s2209_s7 + $0x98] sm:$0xff]  ;;  %v362_v25 = vld [vmem:[%s2194_s5 + $0xa0] sm:$0xff] }
  0xad   : > { %v1253_v19 = vmul.f32 0.5, %v1125_v8  ;;  %v1000_v21 = vmax.f32 %v744_v13, %v872_v16  ;;  %v873_v24 = vld [vmem:[%s2213_s1 + $0x98] sm:$0xff]  ;;  %v490_v28 = vld [vmem:[%s2202_s23 + $0xa0] sm:$0xff]  ;;  %v363_v35 = vld [vmem:[%s2194_s5 + $0xa8] sm:$0xff] }
  0xae   : > { %1380 = vst [vmem:[%s2244_s25 + $0x70] sm:$0xff] %v1252_v7  ;;  %v1127_v20 = vadd.f32 %v999_v10, %v615_v9  ;;  %v1254_v26 = vmul.f32 0.5, %v1126_v14  ;;  %v1001_v27 = vmax.f32 %v745_v23, %v873_v24  ;;  %v746_v29 = vld [vmem:[%s2209_s7 + $0xa0] sm:$0xff]  ;;  %v618_v33 = vmax.f32 %v362_v25, %v490_v28  ;;  %v491_v36 = vld [vmem:[%s2202_s23 + $0xa8] sm:$0xff]  ;;  %v364_v41 = vld [vmem:[%s2194_s5 + $0xb0] sm:$0xff] }
  0xaf   : > { %v874_v30 = vld [vmem:[%s2213_s1 + $0xa0] sm:$0xff]  ;;  %1381 = vst [vmem:[%s2244_s25 + $0x78] sm:$0xff] %v1253_v19  ;;  %v1128_v32 = vadd.f32 %v1000_v21, %v616_v15  ;;  %v747_v37 = vld [vmem:[%s2209_s7 + $0xa8] sm:$0xff]  ;;  %v619_v39 = vmax.f32 %v363_v35, %v491_v36  ;;  %v492_v42 = vld [vmem:[%s2202_s23 + $0xb0] sm:$0xff] }
  0xb0   : > { %v1255_v31 = vmul.f32 0.5, %v1127_v20  ;;  %v1002_v34 = vmax.f32 %v746_v29, %v874_v30  ;;  %1382 = vst [vmem:[%s2244_s25 + $0x80] sm:$0xff] %v1254_v26  ;;  %v1129_v38 = vadd.f32 %v1001_v27, %v617_v22  ;;  %v875_v40 = vld [vmem:[%s2213_s1 + $0xa8] sm:$0xff]  ;;  %v620_v46 = vmax.f32 %v364_v41, %v492_v42  ;;  %v748_v47 = vld [vmem:[%s2209_s7 + $0xb0] sm:$0xff]  ;;  %v365_v49 = vld [vmem:[%s2194_s5 + $0xb8] sm:$0xff] }
  0xb1   : > { %v1256_v43 = vmul.f32 0.5, %v1128_v32  ;;  %v1003_v45 = vmax.f32 %v747_v37, %v875_v40  ;;  %v876_v48 = vld [vmem:[%s2213_s1 + $0xb0] sm:$0xff]  ;;  %v493_v52 = vld [vmem:[%s2202_s23 + $0xb8] sm:$0xff]  ;;  %v366_v59 = vld [vmem:[%s2194_s5 + $0xc0] sm:$0xff] }
  0xb2   : > { %1383 = vst [vmem:[%s2244_s25 + $0x88] sm:$0xff] %v1255_v31  ;;  %v1130_v44 = vadd.f32 %v1002_v34, %v618_v33  ;;  %v1257_v50 = vmul.f32 0.5, %v1129_v38  ;;  %v1004_v51 = vmax.f32 %v748_v47, %v876_v48  ;;  %v749_v53 = vld [vmem:[%s2209_s7 + $0xb8] sm:$0xff]  ;;  %v621_v57 = vmax.f32 %v365_v49, %v493_v52  ;;  %v494_v60 = vld [vmem:[%s2202_s23 + $0xc0] sm:$0xff]  ;;  %v367_v1 = vld [vmem:[%s2194_s5 + $0xc8] sm:$0xff] }
  0xb3   : > { %v877_v54 = vld [vmem:[%s2213_s1 + $0xb8] sm:$0xff]  ;;  %1384 = vst [vmem:[%s2244_s25 + $0x90] sm:$0xff] %v1256_v43  ;;  %v1131_v56 = vadd.f32 %v1003_v45, %v619_v39  ;;  %v750_v61 = vld [vmem:[%s2209_s7 + $0xc0] sm:$0xff]  ;;  %v622_v63 = vmax.f32 %v366_v59, %v494_v60  ;;  %v495_v2 = vld [vmem:[%s2202_s23 + $0xc8] sm:$0xff] }
  0xb4   : > { %v1258_v55 = vmul.f32 0.5, %v1130_v44  ;;  %v1005_v58 = vmax.f32 %v749_v53, %v877_v54  ;;  %1385 = vst [vmem:[%s2244_s25 + $0x98] sm:$0xff] %v1257_v50  ;;  %v1132_v62 = vadd.f32 %v1004_v51, %v620_v46  ;;  %v878_v0 = vld [vmem:[%s2213_s1 + $0xc0] sm:$0xff]  ;;  %v623_v6 = vmax.f32 %v367_v1, %v495_v2  ;;  %v751_v7 = vld [vmem:[%s2209_s7 + $0xc8] sm:$0xff]  ;;  %v368_v9 = vld [vmem:[%s2194_s5 + $0xd0] sm:$0xff] }
  0xb5   : > { %v1259_v3 = vmul.f32 0.5, %v1131_v56  ;;  %v1006_v5 = vmax.f32 %v750_v61, %v878_v0  ;;  %v879_v8 = vld [vmem:[%s2213_s1 + $0xc8] sm:$0xff]  ;;  %v496_v12 = vld [vmem:[%s2202_s23 + $0xd0] sm:$0xff]  ;;  %v369_v19 = vld [vmem:[%s2194_s5 + $0xd8] sm:$0xff] }
  0xb6   : > { %1386 = vst [vmem:[%s2244_s25 + $0xa0] sm:$0xff] %v1258_v55  ;;  %v1133_v4 = vadd.f32 %v1005_v58, %v621_v57  ;;  %v1260_v10 = vmul.f32 0.5, %v1132_v62  ;;  %v1007_v11 = vmax.f32 %v751_v7, %v879_v8  ;;  %v752_v13 = vld [vmem:[%s2209_s7 + $0xd0] sm:$0xff]  ;;  %v624_v17 = vmax.f32 %v368_v9, %v496_v12  ;;  %v497_v20 = vld [vmem:[%s2202_s23 + $0xd8] sm:$0xff]  ;;  %v370_v25 = vld [vmem:[%s2194_s5 + $0xe0] sm:$0xff] }
  0xb7   : > { %v880_v14 = vld [vmem:[%s2213_s1 + $0xd0] sm:$0xff]  ;;  %1387 = vst [vmem:[%s2244_s25 + $0xa8] sm:$0xff] %v1259_v3  ;;  %v1134_v16 = vadd.f32 %v1006_v5, %v622_v63  ;;  %v753_v21 = vld [vmem:[%s2209_s7 + $0xd8] sm:$0xff]  ;;  %v625_v23 = vmax.f32 %v369_v19, %v497_v20  ;;  %v498_v26 = vld [vmem:[%s2202_s23 + $0xe0] sm:$0xff] }
  0xb8   : > { %v1261_v15 = vmul.f32 0.5, %v1133_v4  ;;  %v1008_v18 = vmax.f32 %v752_v13, %v880_v14  ;;  %1388 = vst [vmem:[%s2244_s25 + $0xb0] sm:$0xff] %v1260_v10  ;;  %v1135_v22 = vadd.f32 %v1007_v11, %v623_v6  ;;  %v881_v24 = vld [vmem:[%s2213_s1 + $0xd8] sm:$0xff]  ;;  %v626_v30 = vmax.f32 %v370_v25, %v498_v26  ;;  %v754_v31 = vld [vmem:[%s2209_s7 + $0xe0] sm:$0xff]  ;;  %v371_v33 = vld [vmem:[%s2194_s5 + $0xe8] sm:$0xff] }
  0xb9   : > { %v1262_v27 = vmul.f32 0.5, %v1134_v16  ;;  %v1009_v29 = vmax.f32 %v753_v21, %v881_v24  ;;  %v882_v32 = vld [vmem:[%s2213_s1 + $0xe0] sm:$0xff]  ;;  %v499_v36 = vld [vmem:[%s2202_s23 + $0xe8] sm:$0xff]  ;;  %v372_v43 = vld [vmem:[%s2194_s5 + $0xf0] sm:$0xff] }
  0xba   : > { %1389 = vst [vmem:[%s2244_s25 + $0xb8] sm:$0xff] %v1261_v15  ;;  %v1136_v28 = vadd.f32 %v1008_v18, %v624_v17  ;;  %v1263_v34 = vmul.f32 0.5, %v1135_v22  ;;  %v1010_v35 = vmax.f32 %v754_v31, %v882_v32  ;;  %v755_v37 = vld [vmem:[%s2209_s7 + $0xe8] sm:$0xff]  ;;  %v627_v41 = vmax.f32 %v371_v33, %v499_v36  ;;  %v500_v44 = vld [vmem:[%s2202_s23 + $0xf0] sm:$0xff]  ;;  %v373_v49 = vld [vmem:[%s2194_s5 + $0xf8] sm:$0xff] }
  0xbb   : > { %v883_v38 = vld [vmem:[%s2213_s1 + $0xe8] sm:$0xff]  ;;  %1390 = vst [vmem:[%s2244_s25 + $0xc0] sm:$0xff] %v1262_v27  ;;  %v1137_v40 = vadd.f32 %v1009_v29, %v625_v23  ;;  %v756_v45 = vld [vmem:[%s2209_s7 + $0xf0] sm:$0xff]  ;;  %v628_v47 = vmax.f32 %v372_v43, %v500_v44  ;;  %v501_v50 = vld [vmem:[%s2202_s23 + $0xf8] sm:$0xff] }
  0xbc   : > { %v1264_v39 = vmul.f32 0.5, %v1136_v28  ;;  %v1011_v42 = vmax.f32 %v755_v37, %v883_v38  ;;  %1391 = vst [vmem:[%s2244_s25 + $0xc8] sm:$0xff] %v1263_v34  ;;  %v1138_v46 = vadd.f32 %v1010_v35, %v626_v30  ;;  %v884_v48 = vld [vmem:[%s2213_s1 + $0xf0] sm:$0xff]  ;;  %v629_v54 = vmax.f32 %v373_v49, %v501_v50  ;;  %v757_v55 = vld [vmem:[%s2209_s7 + $0xf8] sm:$0xff]  ;;  %v374_v57 = vld [vmem:[%s2194_s5 + $0x100] sm:$0xff] }
  0xbd   : > { %v1265_v51 = vmul.f32 0.5, %v1137_v40  ;;  %v1012_v53 = vmax.f32 %v756_v45, %v884_v48  ;;  %v885_v56 = vld [vmem:[%s2213_s1 + $0xf8] sm:$0xff]  ;;  %v502_v60 = vld [vmem:[%s2202_s23 + $0x100] sm:$0xff]  ;;  %v375_v3 = vld [vmem:[%s2194_s5 + $0x108] sm:$0xff] }
  0xbe   : > { %1392 = vst [vmem:[%s2244_s25 + $0xd0] sm:$0xff] %v1264_v39  ;;  %v1139_v52 = vadd.f32 %v1011_v42, %v627_v41  ;;  %v1266_v58 = vmul.f32 0.5, %v1138_v46  ;;  %v1013_v59 = vmax.f32 %v757_v55, %v885_v56  ;;  %v758_v61 = vld [vmem:[%s2209_s7 + $0x100] sm:$0xff]  ;;  %v630_v1 = vmax.f32 %v374_v57, %v502_v60  ;;  %v503_v4 = vld [vmem:[%s2202_s23 + $0x108] sm:$0xff]  ;;  %v376_v9 = vld [vmem:[%s2194_s5 + $0x110] sm:$0xff] }
  0xbf   : > { %v886_v62 = vld [vmem:[%s2213_s1 + $0x100] sm:$0xff]  ;;  %1393 = vst [vmem:[%s2244_s25 + $0xd8] sm:$0xff] %v1265_v51  ;;  %v1140_v0 = vadd.f32 %v1012_v53, %v628_v47  ;;  %v759_v5 = vld [vmem:[%s2209_s7 + $0x108] sm:$0xff]  ;;  %v631_v7 = vmax.f32 %v375_v3, %v503_v4  ;;  %v504_v10 = vld [vmem:[%s2202_s23 + $0x110] sm:$0xff] }
  0xc0   : > { %v1267_v63 = vmul.f32 0.5, %v1139_v52  ;;  %v1014_v2 = vmax.f32 %v758_v61, %v886_v62  ;;  %1394 = vst [vmem:[%s2244_s25 + $0xe0] sm:$0xff] %v1266_v58  ;;  %v1141_v6 = vadd.f32 %v1013_v59, %v629_v54  ;;  %v887_v8 = vld [vmem:[%s2213_s1 + $0x108] sm:$0xff]  ;;  %v632_v14 = vmax.f32 %v376_v9, %v504_v10  ;;  %v760_v15 = vld [vmem:[%s2209_s7 + $0x110] sm:$0xff]  ;;  %v377_v17 = vld [vmem:[%s2194_s5 + $0x118] sm:$0xff] }
  0xc1   : > { %v1268_v11 = vmul.f32 0.5, %v1140_v0  ;;  %v1015_v13 = vmax.f32 %v759_v5, %v887_v8  ;;  %v888_v16 = vld [vmem:[%s2213_s1 + $0x110] sm:$0xff]  ;;  %v505_v20 = vld [vmem:[%s2202_s23 + $0x118] sm:$0xff]  ;;  %v378_v27 = vld [vmem:[%s2194_s5 + $0x120] sm:$0xff] }
  0xc2   : > { %1395 = vst [vmem:[%s2244_s25 + $0xe8] sm:$0xff] %v1267_v63  ;;  %v1142_v12 = vadd.f32 %v1014_v2, %v630_v1  ;;  %v1269_v18 = vmul.f32 0.5, %v1141_v6  ;;  %v1016_v19 = vmax.f32 %v760_v15, %v888_v16  ;;  %v761_v21 = vld [vmem:[%s2209_s7 + $0x118] sm:$0xff]  ;;  %v633_v25 = vmax.f32 %v377_v17, %v505_v20  ;;  %v506_v28 = vld [vmem:[%s2202_s23 + $0x120] sm:$0xff]  ;;  %v379_v33 = vld [vmem:[%s2194_s5 + $0x128] sm:$0xff] }
  0xc3   : > { %v889_v22 = vld [vmem:[%s2213_s1 + $0x118] sm:$0xff]  ;;  %1396 = vst [vmem:[%s2244_s25 + $0xf0] sm:$0xff] %v1268_v11  ;;  %v1143_v24 = vadd.f32 %v1015_v13, %v631_v7  ;;  %v762_v29 = vld [vmem:[%s2209_s7 + $0x120] sm:$0xff]  ;;  %v634_v31 = vmax.f32 %v378_v27, %v506_v28  ;;  %v507_v34 = vld [vmem:[%s2202_s23 + $0x128] sm:$0xff] }
  0xc4   : > { %v1270_v23 = vmul.f32 0.5, %v1142_v12  ;;  %v1017_v26 = vmax.f32 %v761_v21, %v889_v22  ;;  %1397 = vst [vmem:[%s2244_s25 + $0xf8] sm:$0xff] %v1269_v18  ;;  %v1144_v30 = vadd.f32 %v1016_v19, %v632_v14  ;;  %v890_v32 = vld [vmem:[%s2213_s1 + $0x120] sm:$0xff]  ;;  %v635_v38 = vmax.f32 %v379_v33, %v507_v34  ;;  %v763_v39 = vld [vmem:[%s2209_s7 + $0x128] sm:$0xff]  ;;  %v380_v41 = vld [vmem:[%s2194_s5 + $0x130] sm:$0xff] }
  0xc5   : > { %v1271_v35 = vmul.f32 0.5, %v1143_v24  ;;  %v1018_v37 = vmax.f32 %v762_v29, %v890_v32  ;;  %v891_v40 = vld [vmem:[%s2213_s1 + $0x128] sm:$0xff]  ;;  %v508_v44 = vld [vmem:[%s2202_s23 + $0x130] sm:$0xff]  ;;  %v381_v51 = vld [vmem:[%s2194_s5 + $0x138] sm:$0xff] }
  0xc6   : > { %1398 = vst [vmem:[%s2244_s25 + $0x100] sm:$0xff] %v1270_v23  ;;  %v1145_v36 = vadd.f32 %v1017_v26, %v633_v25  ;;  %v1272_v42 = vmul.f32 0.5, %v1144_v30  ;;  %v1019_v43 = vmax.f32 %v763_v39, %v891_v40  ;;  %v764_v45 = vld [vmem:[%s2209_s7 + $0x130] sm:$0xff]  ;;  %v636_v49 = vmax.f32 %v380_v41, %v508_v44  ;;  %v509_v52 = vld [vmem:[%s2202_s23 + $0x138] sm:$0xff]  ;;  %v382_v57 = vld [vmem:[%s2194_s5 + $0x140] sm:$0xff] }
  0xc7   : > { %v892_v46 = vld [vmem:[%s2213_s1 + $0x130] sm:$0xff]  ;;  %1399 = vst [vmem:[%s2244_s25 + $0x108] sm:$0xff] %v1271_v35  ;;  %v1146_v48 = vadd.f32 %v1018_v37, %v634_v31  ;;  %v765_v53 = vld [vmem:[%s2209_s7 + $0x138] sm:$0xff]  ;;  %v637_v55 = vmax.f32 %v381_v51, %v509_v52  ;;  %v510_v58 = vld [vmem:[%s2202_s23 + $0x140] sm:$0xff] }
  0xc8   : > { %v1273_v47 = vmul.f32 0.5, %v1145_v36  ;;  %v1020_v50 = vmax.f32 %v764_v45, %v892_v46  ;;  %1400 = vst [vmem:[%s2244_s25 + $0x110] sm:$0xff] %v1272_v42  ;;  %v1147_v54 = vadd.f32 %v1019_v43, %v635_v38  ;;  %v893_v56 = vld [vmem:[%s2213_s1 + $0x138] sm:$0xff]  ;;  %v638_v62 = vmax.f32 %v382_v57, %v510_v58  ;;  %v766_v63 = vld [vmem:[%s2209_s7 + $0x140] sm:$0xff]  ;;  %v383_v1 = vld [vmem:[%s2194_s5 + $0x148] sm:$0xff] }
  0xc9   : > { %v1274_v59 = vmul.f32 0.5, %v1146_v48  ;;  %v1021_v61 = vmax.f32 %v765_v53, %v893_v56  ;;  %v894_v0 = vld [vmem:[%s2213_s1 + $0x140] sm:$0xff]  ;;  %v511_v4 = vld [vmem:[%s2202_s23 + $0x148] sm:$0xff]  ;;  %v384_v11 = vld [vmem:[%s2194_s5 + $0x150] sm:$0xff] }
  0xca   : > { %1401 = vst [vmem:[%s2244_s25 + $0x118] sm:$0xff] %v1273_v47  ;;  %v1148_v60 = vadd.f32 %v1020_v50, %v636_v49  ;;  %v1275_v2 = vmul.f32 0.5, %v1147_v54  ;;  %v1022_v3 = vmax.f32 %v766_v63, %v894_v0  ;;  %v767_v5 = vld [vmem:[%s2209_s7 + $0x148] sm:$0xff]  ;;  %v639_v9 = vmax.f32 %v383_v1, %v511_v4  ;;  %v512_v12 = vld [vmem:[%s2202_s23 + $0x150] sm:$0xff]  ;;  %v385_v17 = vld [vmem:[%s2194_s5 + $0x158] sm:$0xff] }
  0xcb   : > { %v895_v6 = vld [vmem:[%s2213_s1 + $0x148] sm:$0xff]  ;;  %1402 = vst [vmem:[%s2244_s25 + $0x120] sm:$0xff] %v1274_v59  ;;  %v1149_v8 = vadd.f32 %v1021_v61, %v637_v55  ;;  %v768_v13 = vld [vmem:[%s2209_s7 + $0x150] sm:$0xff]  ;;  %v640_v15 = vmax.f32 %v384_v11, %v512_v12  ;;  %v513_v18 = vld [vmem:[%s2202_s23 + $0x158] sm:$0xff] }
  0xcc   : > { %v1276_v7 = vmul.f32 0.5, %v1148_v60  ;;  %v1023_v10 = vmax.f32 %v767_v5, %v895_v6  ;;  %1403 = vst [vmem:[%s2244_s25 + $0x128] sm:$0xff] %v1275_v2  ;;  %v1150_v14 = vadd.f32 %v1022_v3, %v638_v62  ;;  %v896_v16 = vld [vmem:[%s2213_s1 + $0x150] sm:$0xff]  ;;  %v641_v22 = vmax.f32 %v385_v17, %v513_v18  ;;  %v769_v23 = vld [vmem:[%s2209_s7 + $0x158] sm:$0xff]  ;;  %v386_v25 = vld [vmem:[%s2194_s5 + $0x160] sm:$0xff] }
  0xcd   : > { %v1277_v19 = vmul.f32 0.5, %v1149_v8  ;;  %v1024_v21 = vmax.f32 %v768_v13, %v896_v16  ;;  %v897_v24 = vld [vmem:[%s2213_s1 + $0x158] sm:$0xff]  ;;  %v514_v28 = vld [vmem:[%s2202_s23 + $0x160] sm:$0xff]  ;;  %v387_v35 = vld [vmem:[%s2194_s5 + $0x168] sm:$0xff] }
  0xce   : > { %1404 = vst [vmem:[%s2244_s25 + $0x130] sm:$0xff] %v1276_v7  ;;  %v1151_v20 = vadd.f32 %v1023_v10, %v639_v9  ;;  %v1278_v26 = vmul.f32 0.5, %v1150_v14  ;;  %v1025_v27 = vmax.f32 %v769_v23, %v897_v24  ;;  %v770_v29 = vld [vmem:[%s2209_s7 + $0x160] sm:$0xff]  ;;  %v642_v33 = vmax.f32 %v386_v25, %v514_v28  ;;  %v515_v36 = vld [vmem:[%s2202_s23 + $0x168] sm:$0xff]  ;;  %v388_v41 = vld [vmem:[%s2194_s5 + $0x170] sm:$0xff] }
  0xcf   : > { %v898_v30 = vld [vmem:[%s2213_s1 + $0x160] sm:$0xff]  ;;  %1405 = vst [vmem:[%s2244_s25 + $0x138] sm:$0xff] %v1277_v19  ;;  %v1152_v32 = vadd.f32 %v1024_v21, %v640_v15  ;;  %v771_v37 = vld [vmem:[%s2209_s7 + $0x168] sm:$0xff]  ;;  %v643_v39 = vmax.f32 %v387_v35, %v515_v36  ;;  %v516_v42 = vld [vmem:[%s2202_s23 + $0x170] sm:$0xff] }
  0xd0   : > { %v1279_v31 = vmul.f32 0.5, %v1151_v20  ;;  %v1026_v34 = vmax.f32 %v770_v29, %v898_v30  ;;  %1406 = vst [vmem:[%s2244_s25 + $0x140] sm:$0xff] %v1278_v26  ;;  %v1153_v38 = vadd.f32 %v1025_v27, %v641_v22  ;;  %v899_v40 = vld [vmem:[%s2213_s1 + $0x168] sm:$0xff]  ;;  %v644_v46 = vmax.f32 %v388_v41, %v516_v42  ;;  %v772_v47 = vld [vmem:[%s2209_s7 + $0x170] sm:$0xff]  ;;  %v389_v49 = vld [vmem:[%s2194_s5 + $0x178] sm:$0xff] }
  0xd1   : > { %v1280_v43 = vmul.f32 0.5, %v1152_v32  ;;  %v1027_v45 = vmax.f32 %v771_v37, %v899_v40  ;;  %v900_v48 = vld [vmem:[%s2213_s1 + $0x170] sm:$0xff]  ;;  %v517_v52 = vld [vmem:[%s2202_s23 + $0x178] sm:$0xff]  ;;  %v390_v59 = vld [vmem:[%s2194_s5 + $0x180] sm:$0xff] }
  0xd2   : > { %1407 = vst [vmem:[%s2244_s25 + $0x148] sm:$0xff] %v1279_v31  ;;  %v1154_v44 = vadd.f32 %v1026_v34, %v642_v33  ;;  %v1281_v50 = vmul.f32 0.5, %v1153_v38  ;;  %v1028_v51 = vmax.f32 %v772_v47, %v900_v48  ;;  %v773_v53 = vld [vmem:[%s2209_s7 + $0x178] sm:$0xff]  ;;  %v645_v57 = vmax.f32 %v389_v49, %v517_v52  ;;  %v518_v60 = vld [vmem:[%s2202_s23 + $0x180] sm:$0xff]  ;;  %v391_v1 = vld [vmem:[%s2194_s5 + $0x188] sm:$0xff] }
  0xd3   : > { %v901_v54 = vld [vmem:[%s2213_s1 + $0x178] sm:$0xff]  ;;  %1408 = vst [vmem:[%s2244_s25 + $0x150] sm:$0xff] %v1280_v43  ;;  %v1155_v56 = vadd.f32 %v1027_v45, %v643_v39  ;;  %v774_v61 = vld [vmem:[%s2209_s7 + $0x180] sm:$0xff]  ;;  %v646_v63 = vmax.f32 %v390_v59, %v518_v60  ;;  %v519_v2 = vld [vmem:[%s2202_s23 + $0x188] sm:$0xff] }
  0xd4   : > { %v1282_v55 = vmul.f32 0.5, %v1154_v44  ;;  %v1029_v58 = vmax.f32 %v773_v53, %v901_v54  ;;  %1409 = vst [vmem:[%s2244_s25 + $0x158] sm:$0xff] %v1281_v50  ;;  %v1156_v62 = vadd.f32 %v1028_v51, %v644_v46  ;;  %v902_v0 = vld [vmem:[%s2213_s1 + $0x180] sm:$0xff]  ;;  %v647_v6 = vmax.f32 %v391_v1, %v519_v2  ;;  %v775_v7 = vld [vmem:[%s2209_s7 + $0x188] sm:$0xff]  ;;  %v392_v9 = vld [vmem:[%s2194_s5 + $0x190] sm:$0xff] }
  0xd5   : > { %v1283_v3 = vmul.f32 0.5, %v1155_v56  ;;  %v1030_v5 = vmax.f32 %v774_v61, %v902_v0  ;;  %v903_v8 = vld [vmem:[%s2213_s1 + $0x188] sm:$0xff]  ;;  %v520_v12 = vld [vmem:[%s2202_s23 + $0x190] sm:$0xff]  ;;  %v393_v19 = vld [vmem:[%s2194_s5 + $0x198] sm:$0xff] }
  0xd6   : > { %1410 = vst [vmem:[%s2244_s25 + $0x160] sm:$0xff] %v1282_v55  ;;  %v1157_v4 = vadd.f32 %v1029_v58, %v645_v57  ;;  %v1284_v10 = vmul.f32 0.5, %v1156_v62  ;;  %v1031_v11 = vmax.f32 %v775_v7, %v903_v8  ;;  %v776_v13 = vld [vmem:[%s2209_s7 + $0x190] sm:$0xff]  ;;  %v648_v17 = vmax.f32 %v392_v9, %v520_v12  ;;  %v521_v20 = vld [vmem:[%s2202_s23 + $0x198] sm:$0xff]  ;;  %v394_v25 = vld [vmem:[%s2194_s5 + $0x1a0] sm:$0xff] }
  0xd7   : > { %v904_v14 = vld [vmem:[%s2213_s1 + $0x190] sm:$0xff]  ;;  %1411 = vst [vmem:[%s2244_s25 + $0x168] sm:$0xff] %v1283_v3  ;;  %v1158_v16 = vadd.f32 %v1030_v5, %v646_v63  ;;  %v777_v21 = vld [vmem:[%s2209_s7 + $0x198] sm:$0xff]  ;;  %v649_v23 = vmax.f32 %v393_v19, %v521_v20  ;;  %v522_v26 = vld [vmem:[%s2202_s23 + $0x1a0] sm:$0xff] }
  0xd8   : > { %v1285_v15 = vmul.f32 0.5, %v1157_v4  ;;  %v1032_v18 = vmax.f32 %v776_v13, %v904_v14  ;;  %1412 = vst [vmem:[%s2244_s25 + $0x170] sm:$0xff] %v1284_v10  ;;  %v1159_v22 = vadd.f32 %v1031_v11, %v647_v6  ;;  %v905_v24 = vld [vmem:[%s2213_s1 + $0x198] sm:$0xff]  ;;  %v650_v30 = vmax.f32 %v394_v25, %v522_v26  ;;  %v778_v31 = vld [vmem:[%s2209_s7 + $0x1a0] sm:$0xff]  ;;  %v395_v33 = vld [vmem:[%s2194_s5 + $0x1a8] sm:$0xff] }
  0xd9   : > { %v1286_v27 = vmul.f32 0.5, %v1158_v16  ;;  %v1033_v29 = vmax.f32 %v777_v21, %v905_v24  ;;  %v906_v32 = vld [vmem:[%s2213_s1 + $0x1a0] sm:$0xff]  ;;  %v523_v36 = vld [vmem:[%s2202_s23 + $0x1a8] sm:$0xff]  ;;  %v396_v43 = vld [vmem:[%s2194_s5 + $0x1b0] sm:$0xff] }
  0xda   : > { %1413 = vst [vmem:[%s2244_s25 + $0x178] sm:$0xff] %v1285_v15  ;;  %v1160_v28 = vadd.f32 %v1032_v18, %v648_v17  ;;  %v1287_v34 = vmul.f32 0.5, %v1159_v22  ;;  %v1034_v35 = vmax.f32 %v778_v31, %v906_v32  ;;  %v779_v37 = vld [vmem:[%s2209_s7 + $0x1a8] sm:$0xff]  ;;  %v651_v41 = vmax.f32 %v395_v33, %v523_v36  ;;  %v524_v44 = vld [vmem:[%s2202_s23 + $0x1b0] sm:$0xff]  ;;  %v397_v49 = vld [vmem:[%s2194_s5 + $0x1b8] sm:$0xff] }
  0xdb   : > { %v907_v38 = vld [vmem:[%s2213_s1 + $0x1a8] sm:$0xff]  ;;  %1414 = vst [vmem:[%s2244_s25 + $0x180] sm:$0xff] %v1286_v27  ;;  %v1161_v40 = vadd.f32 %v1033_v29, %v649_v23  ;;  %v780_v45 = vld [vmem:[%s2209_s7 + $0x1b0] sm:$0xff]  ;;  %v652_v47 = vmax.f32 %v396_v43, %v524_v44  ;;  %v525_v50 = vld [vmem:[%s2202_s23 + $0x1b8] sm:$0xff] }
  0xdc   : > { %v1288_v39 = vmul.f32 0.5, %v1160_v28  ;;  %v1035_v42 = vmax.f32 %v779_v37, %v907_v38  ;;  %1415 = vst [vmem:[%s2244_s25 + $0x188] sm:$0xff] %v1287_v34  ;;  %v1162_v46 = vadd.f32 %v1034_v35, %v650_v30  ;;  %v908_v48 = vld [vmem:[%s2213_s1 + $0x1b0] sm:$0xff]  ;;  %v653_v54 = vmax.f32 %v397_v49, %v525_v50  ;;  %v781_v55 = vld [vmem:[%s2209_s7 + $0x1b8] sm:$0xff]  ;;  %v398_v57 = vld [vmem:[%s2194_s5 + $0x1c0] sm:$0xff] }
  0xdd   : > { %v1289_v51 = vmul.f32 0.5, %v1161_v40  ;;  %v1036_v53 = vmax.f32 %v780_v45, %v908_v48  ;;  %v909_v56 = vld [vmem:[%s2213_s1 + $0x1b8] sm:$0xff]  ;;  %v526_v60 = vld [vmem:[%s2202_s23 + $0x1c0] sm:$0xff]  ;;  %v399_v3 = vld [vmem:[%s2194_s5 + $0x1c8] sm:$0xff] }
  0xde   : > { %1416 = vst [vmem:[%s2244_s25 + $0x190] sm:$0xff] %v1288_v39  ;;  %v1163_v52 = vadd.f32 %v1035_v42, %v651_v41  ;;  %v1290_v58 = vmul.f32 0.5, %v1162_v46  ;;  %v1037_v59 = vmax.f32 %v781_v55, %v909_v56  ;;  %v782_v61 = vld [vmem:[%s2209_s7 + $0x1c0] sm:$0xff]  ;;  %v654_v1 = vmax.f32 %v398_v57, %v526_v60  ;;  %v527_v4 = vld [vmem:[%s2202_s23 + $0x1c8] sm:$0xff]  ;;  %v400_v9 = vld [vmem:[%s2194_s5 + $0x1d0] sm:$0xff] }
  0xdf   : > { %v910_v62 = vld [vmem:[%s2213_s1 + $0x1c0] sm:$0xff]  ;;  %1417 = vst [vmem:[%s2244_s25 + $0x198] sm:$0xff] %v1289_v51  ;;  %v1164_v0 = vadd.f32 %v1036_v53, %v652_v47  ;;  %v783_v5 = vld [vmem:[%s2209_s7 + $0x1c8] sm:$0xff]  ;;  %v655_v7 = vmax.f32 %v399_v3, %v527_v4  ;;  %v528_v10 = vld [vmem:[%s2202_s23 + $0x1d0] sm:$0xff] }
  0xe0   : > { %v1291_v63 = vmul.f32 0.5, %v1163_v52  ;;  %v1038_v2 = vmax.f32 %v782_v61, %v910_v62  ;;  %1418 = vst [vmem:[%s2244_s25 + $0x1a0] sm:$0xff] %v1290_v58  ;;  %v1165_v6 = vadd.f32 %v1037_v59, %v653_v54  ;;  %v911_v8 = vld [vmem:[%s2213_s1 + $0x1c8] sm:$0xff]  ;;  %v656_v14 = vmax.f32 %v400_v9, %v528_v10  ;;  %v784_v15 = vld [vmem:[%s2209_s7 + $0x1d0] sm:$0xff]  ;;  %v401_v17 = vld [vmem:[%s2194_s5 + $0x1d8] sm:$0xff] }
  0xe1   : > { %v1292_v11 = vmul.f32 0.5, %v1164_v0  ;;  %v1039_v13 = vmax.f32 %v783_v5, %v911_v8  ;;  %v912_v16 = vld [vmem:[%s2213_s1 + $0x1d0] sm:$0xff]  ;;  %v529_v20 = vld [vmem:[%s2202_s23 + $0x1d8] sm:$0xff]  ;;  %v402_v27 = vld [vmem:[%s2194_s5 + $0x1e0] sm:$0xff] }
  0xe2   : > { %1419 = vst [vmem:[%s2244_s25 + $0x1a8] sm:$0xff] %v1291_v63  ;;  %v1166_v12 = vadd.f32 %v1038_v2, %v654_v1  ;;  %v1293_v18 = vmul.f32 0.5, %v1165_v6  ;;  %v1040_v19 = vmax.f32 %v784_v15, %v912_v16  ;;  %v785_v21 = vld [vmem:[%s2209_s7 + $0x1d8] sm:$0xff]  ;;  %v657_v25 = vmax.f32 %v401_v17, %v529_v20  ;;  %v530_v28 = vld [vmem:[%s2202_s23 + $0x1e0] sm:$0xff]  ;;  %v403_v33 = vld [vmem:[%s2194_s5 + $0x1e8] sm:$0xff] }
  0xe3   : > { %v913_v22 = vld [vmem:[%s2213_s1 + $0x1d8] sm:$0xff]  ;;  %1420 = vst [vmem:[%s2244_s25 + $0x1b0] sm:$0xff] %v1292_v11  ;;  %v1167_v24 = vadd.f32 %v1039_v13, %v655_v7  ;;  %v786_v29 = vld [vmem:[%s2209_s7 + $0x1e0] sm:$0xff]  ;;  %v658_v31 = vmax.f32 %v402_v27, %v530_v28  ;;  %v531_v34 = vld [vmem:[%s2202_s23 + $0x1e8] sm:$0xff] }
  0xe4   : > { %v1294_v23 = vmul.f32 0.5, %v1166_v12  ;;  %v1041_v26 = vmax.f32 %v785_v21, %v913_v22  ;;  %1421 = vst [vmem:[%s2244_s25 + $0x1b8] sm:$0xff] %v1293_v18  ;;  %v1168_v30 = vadd.f32 %v1040_v19, %v656_v14  ;;  %v914_v32 = vld [vmem:[%s2213_s1 + $0x1e0] sm:$0xff]  ;;  %v659_v38 = vmax.f32 %v403_v33, %v531_v34  ;;  %v787_v39 = vld [vmem:[%s2209_s7 + $0x1e8] sm:$0xff]  ;;  %v404_v41 = vld [vmem:[%s2194_s5 + $0x1f0] sm:$0xff] }
  0xe5   : > { %v1295_v35 = vmul.f32 0.5, %v1167_v24  ;;  %v1042_v37 = vmax.f32 %v786_v29, %v914_v32  ;;  %v915_v40 = vld [vmem:[%s2213_s1 + $0x1e8] sm:$0xff]  ;;  %v532_v44 = vld [vmem:[%s2202_s23 + $0x1f0] sm:$0xff]  ;;  %v405_v51 = vld [vmem:[%s2194_s5 + $0x1f8] sm:$0xff] }
  0xe6   : > { %1422 = vst [vmem:[%s2244_s25 + $0x1c0] sm:$0xff] %v1294_v23  ;;  %v1169_v36 = vadd.f32 %v1041_v26, %v657_v25  ;;  %v1296_v42 = vmul.f32 0.5, %v1168_v30  ;;  %v1043_v43 = vmax.f32 %v787_v39, %v915_v40  ;;  %v788_v45 = vld [vmem:[%s2209_s7 + $0x1f0] sm:$0xff]  ;;  %v660_v49 = vmax.f32 %v404_v41, %v532_v44  ;;  %v533_v52 = vld [vmem:[%s2202_s23 + $0x1f8] sm:$0xff]  ;;  %v406_v57 = vld [vmem:[%s2194_s5 + $0x200] sm:$0xff] }
  0xe7   : > { %v916_v46 = vld [vmem:[%s2213_s1 + $0x1f0] sm:$0xff]  ;;  %1423 = vst [vmem:[%s2244_s25 + $0x1c8] sm:$0xff] %v1295_v35  ;;  %v1170_v48 = vadd.f32 %v1042_v37, %v658_v31  ;;  %v789_v53 = vld [vmem:[%s2209_s7 + $0x1f8] sm:$0xff]  ;;  %v661_v55 = vmax.f32 %v405_v51, %v533_v52  ;;  %v534_v58 = vld [vmem:[%s2202_s23 + $0x200] sm:$0xff] }
  0xe8   : > { %v1297_v47 = vmul.f32 0.5, %v1169_v36  ;;  %v1044_v50 = vmax.f32 %v788_v45, %v916_v46  ;;  %1424 = vst [vmem:[%s2244_s25 + $0x1d0] sm:$0xff] %v1296_v42  ;;  %v1171_v54 = vadd.f32 %v1043_v43, %v659_v38  ;;  %v917_v56 = vld [vmem:[%s2213_s1 + $0x1f8] sm:$0xff]  ;;  %v662_v62 = vmax.f32 %v406_v57, %v534_v58  ;;  %v790_v63 = vld [vmem:[%s2209_s7 + $0x200] sm:$0xff]  ;;  %v407_v1 = vld [vmem:[%s2194_s5 + $0x208] sm:$0xff] }
  0xe9   : > { %v1298_v59 = vmul.f32 0.5, %v1170_v48  ;;  %v1045_v61 = vmax.f32 %v789_v53, %v917_v56  ;;  %v918_v0 = vld [vmem:[%s2213_s1 + $0x200] sm:$0xff]  ;;  %v535_v4 = vld [vmem:[%s2202_s23 + $0x208] sm:$0xff]  ;;  %v408_v11 = vld [vmem:[%s2194_s5 + $0x210] sm:$0xff] }
  0xea   : > { %1425 = vst [vmem:[%s2244_s25 + $0x1d8] sm:$0xff] %v1297_v47  ;;  %v1172_v60 = vadd.f32 %v1044_v50, %v660_v49  ;;  %v1299_v2 = vmul.f32 0.5, %v1171_v54  ;;  %v1046_v3 = vmax.f32 %v790_v63, %v918_v0  ;;  %v791_v5 = vld [vmem:[%s2209_s7 + $0x208] sm:$0xff]  ;;  %v663_v9 = vmax.f32 %v407_v1, %v535_v4  ;;  %v536_v12 = vld [vmem:[%s2202_s23 + $0x210] sm:$0xff]  ;;  %v409_v17 = vld [vmem:[%s2194_s5 + $0x218] sm:$0xff] }
  0xeb   : > { %v919_v6 = vld [vmem:[%s2213_s1 + $0x208] sm:$0xff]  ;;  %1426 = vst [vmem:[%s2244_s25 + $0x1e0] sm:$0xff] %v1298_v59  ;;  %v1173_v8 = vadd.f32 %v1045_v61, %v661_v55  ;;  %v792_v13 = vld [vmem:[%s2209_s7 + $0x210] sm:$0xff]  ;;  %v664_v15 = vmax.f32 %v408_v11, %v536_v12  ;;  %v537_v18 = vld [vmem:[%s2202_s23 + $0x218] sm:$0xff] }
  0xec   : > { %v1300_v7 = vmul.f32 0.5, %v1172_v60  ;;  %v1047_v10 = vmax.f32 %v791_v5, %v919_v6  ;;  %1427 = vst [vmem:[%s2244_s25 + $0x1e8] sm:$0xff] %v1299_v2  ;;  %v1174_v14 = vadd.f32 %v1046_v3, %v662_v62  ;;  %v920_v16 = vld [vmem:[%s2213_s1 + $0x210] sm:$0xff]  ;;  %v665_v22 = vmax.f32 %v409_v17, %v537_v18  ;;  %v793_v23 = vld [vmem:[%s2209_s7 + $0x218] sm:$0xff]  ;;  %v410_v25 = vld [vmem:[%s2194_s5 + $0x220] sm:$0xff] }
  0xed   : > { %v1301_v19 = vmul.f32 0.5, %v1173_v8  ;;  %v1048_v21 = vmax.f32 %v792_v13, %v920_v16  ;;  %v921_v24 = vld [vmem:[%s2213_s1 + $0x218] sm:$0xff]  ;;  %v538_v28 = vld [vmem:[%s2202_s23 + $0x220] sm:$0xff]  ;;  %v411_v35 = vld [vmem:[%s2194_s5 + $0x228] sm:$0xff] }
  0xee   : > { %1428 = vst [vmem:[%s2244_s25 + $0x1f0] sm:$0xff] %v1300_v7  ;;  %v1175_v20 = vadd.f32 %v1047_v10, %v663_v9  ;;  %v1302_v26 = vmul.f32 0.5, %v1174_v14  ;;  %v1049_v27 = vmax.f32 %v793_v23, %v921_v24  ;;  %v794_v29 = vld [vmem:[%s2209_s7 + $0x220] sm:$0xff]  ;;  %v666_v33 = vmax.f32 %v410_v25, %v538_v28  ;;  %v539_v36 = vld [vmem:[%s2202_s23 + $0x228] sm:$0xff]  ;;  %v412_v41 = vld [vmem:[%s2194_s5 + $0x230] sm:$0xff] }
  0xef   : > { %v922_v30 = vld [vmem:[%s2213_s1 + $0x220] sm:$0xff]  ;;  %1429 = vst [vmem:[%s2244_s25 + $0x1f8] sm:$0xff] %v1301_v19  ;;  %v1176_v32 = vadd.f32 %v1048_v21, %v664_v15  ;;  %v795_v37 = vld [vmem:[%s2209_s7 + $0x228] sm:$0xff]  ;;  %v667_v39 = vmax.f32 %v411_v35, %v539_v36  ;;  %v540_v42 = vld [vmem:[%s2202_s23 + $0x230] sm:$0xff] }
  0xf0   : > { %v1303_v31 = vmul.f32 0.5, %v1175_v20  ;;  %v1050_v34 = vmax.f32 %v794_v29, %v922_v30  ;;  %1430 = vst [vmem:[%s2244_s25 + $0x200] sm:$0xff] %v1302_v26  ;;  %v1177_v38 = vadd.f32 %v1049_v27, %v665_v22  ;;  %v923_v40 = vld [vmem:[%s2213_s1 + $0x228] sm:$0xff]  ;;  %v668_v46 = vmax.f32 %v412_v41, %v540_v42  ;;  %v796_v47 = vld [vmem:[%s2209_s7 + $0x230] sm:$0xff]  ;;  %v413_v49 = vld [vmem:[%s2194_s5 + $0x238] sm:$0xff] }
  0xf1   : > { %v1304_v43 = vmul.f32 0.5, %v1176_v32  ;;  %v1051_v45 = vmax.f32 %v795_v37, %v923_v40  ;;  %v924_v48 = vld [vmem:[%s2213_s1 + $0x230] sm:$0xff]  ;;  %v541_v52 = vld [vmem:[%s2202_s23 + $0x238] sm:$0xff]  ;;  %v414_v59 = vld [vmem:[%s2194_s5 + $0x240] sm:$0xff] }
  0xf2   : > { %1431 = vst [vmem:[%s2244_s25 + $0x208] sm:$0xff] %v1303_v31  ;;  %v1178_v44 = vadd.f32 %v1050_v34, %v666_v33  ;;  %v1305_v50 = vmul.f32 0.5, %v1177_v38  ;;  %v1052_v51 = vmax.f32 %v796_v47, %v924_v48  ;;  %v797_v53 = vld [vmem:[%s2209_s7 + $0x238] sm:$0xff]  ;;  %v669_v57 = vmax.f32 %v413_v49, %v541_v52  ;;  %v542_v60 = vld [vmem:[%s2202_s23 + $0x240] sm:$0xff]  ;;  %v415_v1 = vld [vmem:[%s2194_s5 + $0x248] sm:$0xff] }
  0xf3   : > { %v925_v54 = vld [vmem:[%s2213_s1 + $0x238] sm:$0xff]  ;;  %1432 = vst [vmem:[%s2244_s25 + $0x210] sm:$0xff] %v1304_v43  ;;  %v1179_v56 = vadd.f32 %v1051_v45, %v667_v39  ;;  %v798_v61 = vld [vmem:[%s2209_s7 + $0x240] sm:$0xff]  ;;  %v670_v63 = vmax.f32 %v414_v59, %v542_v60  ;;  %v543_v2 = vld [vmem:[%s2202_s23 + $0x248] sm:$0xff] }
  0xf4   : > { %v1306_v55 = vmul.f32 0.5, %v1178_v44  ;;  %v1053_v58 = vmax.f32 %v797_v53, %v925_v54  ;;  %1433 = vst [vmem:[%s2244_s25 + $0x218] sm:$0xff] %v1305_v50  ;;  %v1180_v62 = vadd.f32 %v1052_v51, %v668_v46  ;;  %v926_v0 = vld [vmem:[%s2213_s1 + $0x240] sm:$0xff]  ;;  %v671_v6 = vmax.f32 %v415_v1, %v543_v2  ;;  %v799_v7 = vld [vmem:[%s2209_s7 + $0x248] sm:$0xff]  ;;  %v416_v9 = vld [vmem:[%s2194_s5 + $0x250] sm:$0xff] }
  0xf5   : > { %v1307_v3 = vmul.f32 0.5, %v1179_v56  ;;  %v1054_v5 = vmax.f32 %v798_v61, %v926_v0  ;;  %v927_v8 = vld [vmem:[%s2213_s1 + $0x248] sm:$0xff]  ;;  %v544_v12 = vld [vmem:[%s2202_s23 + $0x250] sm:$0xff]  ;;  %v417_v19 = vld [vmem:[%s2194_s5 + $0x258] sm:$0xff] }
  0xf6   : > { %1434 = vst [vmem:[%s2244_s25 + $0x220] sm:$0xff] %v1306_v55  ;;  %v1181_v4 = vadd.f32 %v1053_v58, %v669_v57  ;;  %v1308_v10 = vmul.f32 0.5, %v1180_v62  ;;  %v1055_v11 = vmax.f32 %v799_v7, %v927_v8  ;;  %v800_v13 = vld [vmem:[%s2209_s7 + $0x250] sm:$0xff]  ;;  %v672_v17 = vmax.f32 %v416_v9, %v544_v12  ;;  %v545_v20 = vld [vmem:[%s2202_s23 + $0x258] sm:$0xff]  ;;  %v418_v25 = vld [vmem:[%s2194_s5 + $0x260] sm:$0xff] }
  0xf7   : > { %v928_v14 = vld [vmem:[%s2213_s1 + $0x250] sm:$0xff]  ;;  %1435 = vst [vmem:[%s2244_s25 + $0x228] sm:$0xff] %v1307_v3  ;;  %v1182_v16 = vadd.f32 %v1054_v5, %v670_v63  ;;  %v801_v21 = vld [vmem:[%s2209_s7 + $0x258] sm:$0xff]  ;;  %v673_v23 = vmax.f32 %v417_v19, %v545_v20  ;;  %v546_v26 = vld [vmem:[%s2202_s23 + $0x260] sm:$0xff] }
  0xf8   : > { %v1309_v15 = vmul.f32 0.5, %v1181_v4  ;;  %v1056_v18 = vmax.f32 %v800_v13, %v928_v14  ;;  %1436 = vst [vmem:[%s2244_s25 + $0x230] sm:$0xff] %v1308_v10  ;;  %v1183_v22 = vadd.f32 %v1055_v11, %v671_v6  ;;  %v929_v24 = vld [vmem:[%s2213_s1 + $0x258] sm:$0xff]  ;;  %v674_v30 = vmax.f32 %v418_v25, %v546_v26  ;;  %v802_v31 = vld [vmem:[%s2209_s7 + $0x260] sm:$0xff]  ;;  %v419_v33 = vld [vmem:[%s2194_s5 + $0x268] sm:$0xff] }
  0xf9   : > { %v1310_v27 = vmul.f32 0.5, %v1182_v16  ;;  %v1057_v29 = vmax.f32 %v801_v21, %v929_v24  ;;  %v930_v32 = vld [vmem:[%s2213_s1 + $0x260] sm:$0xff]  ;;  %v547_v36 = vld [vmem:[%s2202_s23 + $0x268] sm:$0xff]  ;;  %v420_v43 = vld [vmem:[%s2194_s5 + $0x270] sm:$0xff] }
  0xfa   : > { %1437 = vst [vmem:[%s2244_s25 + $0x238] sm:$0xff] %v1309_v15  ;;  %v1184_v28 = vadd.f32 %v1056_v18, %v672_v17  ;;  %v1311_v34 = vmul.f32 0.5, %v1183_v22  ;;  %v1058_v35 = vmax.f32 %v802_v31, %v930_v32  ;;  %v803_v37 = vld [vmem:[%s2209_s7 + $0x268] sm:$0xff]  ;;  %v675_v41 = vmax.f32 %v419_v33, %v547_v36  ;;  %v548_v44 = vld [vmem:[%s2202_s23 + $0x270] sm:$0xff]  ;;  %v421_v49 = vld [vmem:[%s2194_s5 + $0x278] sm:$0xff] }
  0xfb   : > { %v931_v38 = vld [vmem:[%s2213_s1 + $0x268] sm:$0xff]  ;;  %1438 = vst [vmem:[%s2244_s25 + $0x240] sm:$0xff] %v1310_v27  ;;  %v1185_v40 = vadd.f32 %v1057_v29, %v673_v23  ;;  %v804_v45 = vld [vmem:[%s2209_s7 + $0x270] sm:$0xff]  ;;  %v676_v47 = vmax.f32 %v420_v43, %v548_v44  ;;  %v549_v50 = vld [vmem:[%s2202_s23 + $0x278] sm:$0xff] }
  0xfc   : > { %v1312_v39 = vmul.f32 0.5, %v1184_v28  ;;  %v1059_v42 = vmax.f32 %v803_v37, %v931_v38  ;;  %1439 = vst [vmem:[%s2244_s25 + $0x248] sm:$0xff] %v1311_v34  ;;  %v1186_v46 = vadd.f32 %v1058_v35, %v674_v30  ;;  %v932_v48 = vld [vmem:[%s2213_s1 + $0x270] sm:$0xff]  ;;  %v677_v54 = vmax.f32 %v421_v49, %v549_v50  ;;  %v805_v55 = vld [vmem:[%s2209_s7 + $0x278] sm:$0xff]  ;;  %v422_v57 = vld [vmem:[%s2194_s5 + $0x280] sm:$0xff] }
  0xfd   : > { %v1313_v51 = vmul.f32 0.5, %v1185_v40  ;;  %v1060_v53 = vmax.f32 %v804_v45, %v932_v48  ;;  %v933_v56 = vld [vmem:[%s2213_s1 + $0x278] sm:$0xff]  ;;  %v550_v60 = vld [vmem:[%s2202_s23 + $0x280] sm:$0xff]  ;;  %v423_v3 = vld [vmem:[%s2194_s5 + $0x288] sm:$0xff] }
  0xfe   : > { %1440 = vst [vmem:[%s2244_s25 + $0x250] sm:$0xff] %v1312_v39  ;;  %v1187_v52 = vadd.f32 %v1059_v42, %v675_v41  ;;  %v1314_v58 = vmul.f32 0.5, %v1186_v46  ;;  %v1061_v59 = vmax.f32 %v805_v55, %v933_v56  ;;  %v806_v61 = vld [vmem:[%s2209_s7 + $0x280] sm:$0xff]  ;;  %v678_v1 = vmax.f32 %v422_v57, %v550_v60  ;;  %v551_v4 = vld [vmem:[%s2202_s23 + $0x288] sm:$0xff]  ;;  %v424_v9 = vld [vmem:[%s2194_s5 + $0x290] sm:$0xff] }
  0xff   : > { %v934_v62 = vld [vmem:[%s2213_s1 + $0x280] sm:$0xff]  ;;  %1441 = vst [vmem:[%s2244_s25 + $0x258] sm:$0xff] %v1313_v51  ;;  %v1188_v0 = vadd.f32 %v1060_v53, %v676_v47  ;;  %v807_v5 = vld [vmem:[%s2209_s7 + $0x288] sm:$0xff]  ;;  %v679_v7 = vmax.f32 %v423_v3, %v551_v4  ;;  %v552_v10 = vld [vmem:[%s2202_s23 + $0x290] sm:$0xff] }
 0x100   : > { %v1315_v63 = vmul.f32 0.5, %v1187_v52  ;;  %v1062_v2 = vmax.f32 %v806_v61, %v934_v62  ;;  %1442 = vst [vmem:[%s2244_s25 + $0x260] sm:$0xff] %v1314_v58  ;;  %v1189_v6 = vadd.f32 %v1061_v59, %v677_v54  ;;  %v935_v8 = vld [vmem:[%s2213_s1 + $0x288] sm:$0xff]  ;;  %v680_v14 = vmax.f32 %v424_v9, %v552_v10  ;;  %v808_v15 = vld [vmem:[%s2209_s7 + $0x290] sm:$0xff]  ;;  %v425_v17 = vld [vmem:[%s2194_s5 + $0x298] sm:$0xff] }
 0x101   : > { %v1316_v11 = vmul.f32 0.5, %v1188_v0  ;;  %v1063_v13 = vmax.f32 %v807_v5, %v935_v8  ;;  %v936_v16 = vld [vmem:[%s2213_s1 + $0x290] sm:$0xff]  ;;  %v553_v20 = vld [vmem:[%s2202_s23 + $0x298] sm:$0xff]  ;;  %v426_v27 = vld [vmem:[%s2194_s5 + $0x2a0] sm:$0xff] }
 0x102   : > { %1443 = vst [vmem:[%s2244_s25 + $0x268] sm:$0xff] %v1315_v63  ;;  %v1190_v12 = vadd.f32 %v1062_v2, %v678_v1  ;;  %v1317_v18 = vmul.f32 0.5, %v1189_v6  ;;  %v1064_v19 = vmax.f32 %v808_v15, %v936_v16  ;;  %v809_v21 = vld [vmem:[%s2209_s7 + $0x298] sm:$0xff]  ;;  %v681_v25 = vmax.f32 %v425_v17, %v553_v20  ;;  %v554_v28 = vld [vmem:[%s2202_s23 + $0x2a0] sm:$0xff]  ;;  %v427_v33 = vld [vmem:[%s2194_s5 + $0x2a8] sm:$0xff] }
 0x103   : > { %v937_v22 = vld [vmem:[%s2213_s1 + $0x298] sm:$0xff]  ;;  %1444 = vst [vmem:[%s2244_s25 + $0x270] sm:$0xff] %v1316_v11  ;;  %v1191_v24 = vadd.f32 %v1063_v13, %v679_v7  ;;  %v810_v29 = vld [vmem:[%s2209_s7 + $0x2a0] sm:$0xff]  ;;  %v682_v31 = vmax.f32 %v426_v27, %v554_v28  ;;  %v555_v34 = vld [vmem:[%s2202_s23 + $0x2a8] sm:$0xff] }
 0x104   : > { %v1318_v23 = vmul.f32 0.5, %v1190_v12  ;;  %v1065_v26 = vmax.f32 %v809_v21, %v937_v22  ;;  %1445 = vst [vmem:[%s2244_s25 + $0x278] sm:$0xff] %v1317_v18  ;;  %v1192_v30 = vadd.f32 %v1064_v19, %v680_v14  ;;  %v938_v32 = vld [vmem:[%s2213_s1 + $0x2a0] sm:$0xff]  ;;  %v683_v38 = vmax.f32 %v427_v33, %v555_v34  ;;  %v811_v39 = vld [vmem:[%s2209_s7 + $0x2a8] sm:$0xff]  ;;  %v428_v41 = vld [vmem:[%s2194_s5 + $0x2b0] sm:$0xff] }
 0x105   : > { %v1319_v35 = vmul.f32 0.5, %v1191_v24  ;;  %v1066_v37 = vmax.f32 %v810_v29, %v938_v32  ;;  %v939_v40 = vld [vmem:[%s2213_s1 + $0x2a8] sm:$0xff]  ;;  %v556_v44 = vld [vmem:[%s2202_s23 + $0x2b0] sm:$0xff]  ;;  %v429_v51 = vld [vmem:[%s2194_s5 + $0x2b8] sm:$0xff] }
 0x106   : > { %1446 = vst [vmem:[%s2244_s25 + $0x280] sm:$0xff] %v1318_v23  ;;  %v1193_v36 = vadd.f32 %v1065_v26, %v681_v25  ;;  %v1320_v42 = vmul.f32 0.5, %v1192_v30  ;;  %v1067_v43 = vmax.f32 %v811_v39, %v939_v40  ;;  %v812_v45 = vld [vmem:[%s2209_s7 + $0x2b0] sm:$0xff]  ;;  %v684_v49 = vmax.f32 %v428_v41, %v556_v44  ;;  %v557_v52 = vld [vmem:[%s2202_s23 + $0x2b8] sm:$0xff]  ;;  %v430_v57 = vld [vmem:[%s2194_s5 + $0x2c0] sm:$0xff] }
 0x107   : > { %v940_v46 = vld [vmem:[%s2213_s1 + $0x2b0] sm:$0xff]  ;;  %1447 = vst [vmem:[%s2244_s25 + $0x288] sm:$0xff] %v1319_v35  ;;  %v1194_v48 = vadd.f32 %v1066_v37, %v682_v31  ;;  %v813_v53 = vld [vmem:[%s2209_s7 + $0x2b8] sm:$0xff]  ;;  %v685_v55 = vmax.f32 %v429_v51, %v557_v52  ;;  %v558_v58 = vld [vmem:[%s2202_s23 + $0x2c0] sm:$0xff] }
 0x108   : > { %v1321_v47 = vmul.f32 0.5, %v1193_v36  ;;  %v1068_v50 = vmax.f32 %v812_v45, %v940_v46  ;;  %1448 = vst [vmem:[%s2244_s25 + $0x290] sm:$0xff] %v1320_v42  ;;  %v1195_v54 = vadd.f32 %v1067_v43, %v683_v38  ;;  %v941_v56 = vld [vmem:[%s2213_s1 + $0x2b8] sm:$0xff]  ;;  %v686_v62 = vmax.f32 %v430_v57, %v558_v58  ;;  %v814_v63 = vld [vmem:[%s2209_s7 + $0x2c0] sm:$0xff]  ;;  %v431_v1 = vld [vmem:[%s2194_s5 + $0x2c8] sm:$0xff] }
 0x109   : > { %v1322_v59 = vmul.f32 0.5, %v1194_v48  ;;  %v1069_v61 = vmax.f32 %v813_v53, %v941_v56  ;;  %v942_v0 = vld [vmem:[%s2213_s1 + $0x2c0] sm:$0xff]  ;;  %v559_v4 = vld [vmem:[%s2202_s23 + $0x2c8] sm:$0xff]  ;;  %v432_v11 = vld [vmem:[%s2194_s5 + $0x2d0] sm:$0xff] }
 0x10a   : > { %1449 = vst [vmem:[%s2244_s25 + $0x298] sm:$0xff] %v1321_v47  ;;  %v1196_v60 = vadd.f32 %v1068_v50, %v684_v49  ;;  %v1323_v2 = vmul.f32 0.5, %v1195_v54  ;;  %v1070_v3 = vmax.f32 %v814_v63, %v942_v0  ;;  %v815_v5 = vld [vmem:[%s2209_s7 + $0x2c8] sm:$0xff]  ;;  %v687_v9 = vmax.f32 %v431_v1, %v559_v4  ;;  %v560_v12 = vld [vmem:[%s2202_s23 + $0x2d0] sm:$0xff]  ;;  %v433_v17 = vld [vmem:[%s2194_s5 + $0x2d8] sm:$0xff] }
 0x10b   : > { %v943_v6 = vld [vmem:[%s2213_s1 + $0x2c8] sm:$0xff]  ;;  %1450 = vst [vmem:[%s2244_s25 + $0x2a0] sm:$0xff] %v1322_v59  ;;  %v1197_v8 = vadd.f32 %v1069_v61, %v685_v55  ;;  %v816_v13 = vld [vmem:[%s2209_s7 + $0x2d0] sm:$0xff]  ;;  %v688_v15 = vmax.f32 %v432_v11, %v560_v12  ;;  %v561_v18 = vld [vmem:[%s2202_s23 + $0x2d8] sm:$0xff] }
 0x10c   : > { %v1324_v7 = vmul.f32 0.5, %v1196_v60  ;;  %v1071_v10 = vmax.f32 %v815_v5, %v943_v6  ;;  %1451 = vst [vmem:[%s2244_s25 + $0x2a8] sm:$0xff] %v1323_v2  ;;  %v1198_v14 = vadd.f32 %v1070_v3, %v686_v62  ;;  %v944_v16 = vld [vmem:[%s2213_s1 + $0x2d0] sm:$0xff]  ;;  %v689_v22 = vmax.f32 %v433_v17, %v561_v18  ;;  %v817_v23 = vld [vmem:[%s2209_s7 + $0x2d8] sm:$0xff]  ;;  %v434_v25 = vld [vmem:[%s2194_s5 + $0x2e0] sm:$0xff] }
 0x10d   : > { %v1325_v19 = vmul.f32 0.5, %v1197_v8  ;;  %v1072_v21 = vmax.f32 %v816_v13, %v944_v16  ;;  %v945_v24 = vld [vmem:[%s2213_s1 + $0x2d8] sm:$0xff]  ;;  %v562_v28 = vld [vmem:[%s2202_s23 + $0x2e0] sm:$0xff]  ;;  %v435_v35 = vld [vmem:[%s2194_s5 + $0x2e8] sm:$0xff] }
 0x10e   : > { %1452 = vst [vmem:[%s2244_s25 + $0x2b0] sm:$0xff] %v1324_v7  ;;  %v1199_v20 = vadd.f32 %v1071_v10, %v687_v9  ;;  %v1326_v26 = vmul.f32 0.5, %v1198_v14  ;;  %v1073_v27 = vmax.f32 %v817_v23, %v945_v24  ;;  %v818_v29 = vld [vmem:[%s2209_s7 + $0x2e0] sm:$0xff]  ;;  %v690_v33 = vmax.f32 %v434_v25, %v562_v28  ;;  %v563_v36 = vld [vmem:[%s2202_s23 + $0x2e8] sm:$0xff]  ;;  %v436_v41 = vld [vmem:[%s2194_s5 + $0x2f0] sm:$0xff] }
 0x10f   : > { %v946_v30 = vld [vmem:[%s2213_s1 + $0x2e0] sm:$0xff]  ;;  %1453 = vst [vmem:[%s2244_s25 + $0x2b8] sm:$0xff] %v1325_v19  ;;  %v1200_v32 = vadd.f32 %v1072_v21, %v688_v15  ;;  %v819_v37 = vld [vmem:[%s2209_s7 + $0x2e8] sm:$0xff]  ;;  %v691_v39 = vmax.f32 %v435_v35, %v563_v36  ;;  %v564_v42 = vld [vmem:[%s2202_s23 + $0x2f0] sm:$0xff] }
 0x110   : > { %v1327_v31 = vmul.f32 0.5, %v1199_v20  ;;  %v1074_v34 = vmax.f32 %v818_v29, %v946_v30  ;;  %1454 = vst [vmem:[%s2244_s25 + $0x2c0] sm:$0xff] %v1326_v26  ;;  %v1201_v38 = vadd.f32 %v1073_v27, %v689_v22  ;;  %v947_v40 = vld [vmem:[%s2213_s1 + $0x2e8] sm:$0xff]  ;;  %v692_v46 = vmax.f32 %v436_v41, %v564_v42  ;;  %v820_v47 = vld [vmem:[%s2209_s7 + $0x2f0] sm:$0xff]  ;;  %v437_v49 = vld [vmem:[%s2194_s5 + $0x2f8] sm:$0xff] }
 0x111   : > { %v1328_v43 = vmul.f32 0.5, %v1200_v32  ;;  %v1075_v45 = vmax.f32 %v819_v37, %v947_v40  ;;  %v948_v48 = vld [vmem:[%s2213_s1 + $0x2f0] sm:$0xff]  ;;  %v565_v52 = vld [vmem:[%s2202_s23 + $0x2f8] sm:$0xff]  ;;  %v438_v59 = vld [vmem:[%s2194_s5 + $0x300] sm:$0xff] }
 0x112   : > { %1455 = vst [vmem:[%s2244_s25 + $0x2c8] sm:$0xff] %v1327_v31  ;;  %v1202_v44 = vadd.f32 %v1074_v34, %v690_v33  ;;  %v1329_v50 = vmul.f32 0.5, %v1201_v38  ;;  %v1076_v51 = vmax.f32 %v820_v47, %v948_v48  ;;  %v821_v53 = vld [vmem:[%s2209_s7 + $0x2f8] sm:$0xff]  ;;  %v693_v57 = vmax.f32 %v437_v49, %v565_v52  ;;  %v566_v60 = vld [vmem:[%s2202_s23 + $0x300] sm:$0xff]  ;;  %v439_v1 = vld [vmem:[%s2194_s5 + $0x308] sm:$0xff] }
 0x113   : > { %v949_v54 = vld [vmem:[%s2213_s1 + $0x2f8] sm:$0xff]  ;;  %1456 = vst [vmem:[%s2244_s25 + $0x2d0] sm:$0xff] %v1328_v43  ;;  %v1203_v56 = vadd.f32 %v1075_v45, %v691_v39  ;;  %v822_v61 = vld [vmem:[%s2209_s7 + $0x300] sm:$0xff]  ;;  %v694_v63 = vmax.f32 %v438_v59, %v566_v60  ;;  %v567_v2 = vld [vmem:[%s2202_s23 + $0x308] sm:$0xff] }
 0x114   : > { %v1330_v55 = vmul.f32 0.5, %v1202_v44  ;;  %v1077_v58 = vmax.f32 %v821_v53, %v949_v54  ;;  %1457 = vst [vmem:[%s2244_s25 + $0x2d8] sm:$0xff] %v1329_v50  ;;  %v1204_v62 = vadd.f32 %v1076_v51, %v692_v46  ;;  %v950_v0 = vld [vmem:[%s2213_s1 + $0x300] sm:$0xff]  ;;  %v695_v6 = vmax.f32 %v439_v1, %v567_v2  ;;  %v823_v7 = vld [vmem:[%s2209_s7 + $0x308] sm:$0xff]  ;;  %v440_v9 = vld [vmem:[%s2194_s5 + $0x310] sm:$0xff] }
 0x115   : > { %v1331_v3 = vmul.f32 0.5, %v1203_v56  ;;  %v1078_v5 = vmax.f32 %v822_v61, %v950_v0  ;;  %v951_v8 = vld [vmem:[%s2213_s1 + $0x308] sm:$0xff]  ;;  %v568_v12 = vld [vmem:[%s2202_s23 + $0x310] sm:$0xff]  ;;  %v441_v19 = vld [vmem:[%s2194_s5 + $0x318] sm:$0xff] }
 0x116   : > { %1458 = vst [vmem:[%s2244_s25 + $0x2e0] sm:$0xff] %v1330_v55  ;;  %v1205_v4 = vadd.f32 %v1077_v58, %v693_v57  ;;  %v1332_v10 = vmul.f32 0.5, %v1204_v62  ;;  %v1079_v11 = vmax.f32 %v823_v7, %v951_v8  ;;  %v824_v13 = vld [vmem:[%s2209_s7 + $0x310] sm:$0xff]  ;;  %v696_v17 = vmax.f32 %v440_v9, %v568_v12  ;;  %v569_v20 = vld [vmem:[%s2202_s23 + $0x318] sm:$0xff]  ;;  %v442_v25 = vld [vmem:[%s2194_s5 + $0x320] sm:$0xff] }
 0x117   : > { %v952_v14 = vld [vmem:[%s2213_s1 + $0x310] sm:$0xff]  ;;  %1459 = vst [vmem:[%s2244_s25 + $0x2e8] sm:$0xff] %v1331_v3  ;;  %v1206_v16 = vadd.f32 %v1078_v5, %v694_v63  ;;  %v825_v21 = vld [vmem:[%s2209_s7 + $0x318] sm:$0xff]  ;;  %v697_v23 = vmax.f32 %v441_v19, %v569_v20  ;;  %v570_v26 = vld [vmem:[%s2202_s23 + $0x320] sm:$0xff] }
 0x118   : > { %v1333_v15 = vmul.f32 0.5, %v1205_v4  ;;  %v1080_v18 = vmax.f32 %v824_v13, %v952_v14  ;;  %1460 = vst [vmem:[%s2244_s25 + $0x2f0] sm:$0xff] %v1332_v10  ;;  %v1207_v22 = vadd.f32 %v1079_v11, %v695_v6  ;;  %v953_v24 = vld [vmem:[%s2213_s1 + $0x318] sm:$0xff]  ;;  %v698_v30 = vmax.f32 %v442_v25, %v570_v26  ;;  %v826_v31 = vld [vmem:[%s2209_s7 + $0x320] sm:$0xff]  ;;  %v443_v33 = vld [vmem:[%s2194_s5 + $0x328] sm:$0xff] }
 0x119   : > { %v1334_v27 = vmul.f32 0.5, %v1206_v16  ;;  %v1081_v29 = vmax.f32 %v825_v21, %v953_v24  ;;  %v954_v32 = vld [vmem:[%s2213_s1 + $0x320] sm:$0xff]  ;;  %v571_v36 = vld [vmem:[%s2202_s23 + $0x328] sm:$0xff]  ;;  %v444_v43 = vld [vmem:[%s2194_s5 + $0x330] sm:$0xff] }
 0x11a   : > { %1461 = vst [vmem:[%s2244_s25 + $0x2f8] sm:$0xff] %v1333_v15  ;;  %v1208_v28 = vadd.f32 %v1080_v18, %v696_v17  ;;  %v1335_v34 = vmul.f32 0.5, %v1207_v22  ;;  %v1082_v35 = vmax.f32 %v826_v31, %v954_v32  ;;  %v827_v37 = vld [vmem:[%s2209_s7 + $0x328] sm:$0xff]  ;;  %v699_v41 = vmax.f32 %v443_v33, %v571_v36  ;;  %v572_v44 = vld [vmem:[%s2202_s23 + $0x330] sm:$0xff]  ;;  %v445_v49 = vld [vmem:[%s2194_s5 + $0x338] sm:$0xff] }
 0x11b   : > { %v955_v38 = vld [vmem:[%s2213_s1 + $0x328] sm:$0xff]  ;;  %1462 = vst [vmem:[%s2244_s25 + $0x300] sm:$0xff] %v1334_v27  ;;  %v1209_v40 = vadd.f32 %v1081_v29, %v697_v23  ;;  %v828_v45 = vld [vmem:[%s2209_s7 + $0x330] sm:$0xff]  ;;  %v700_v47 = vmax.f32 %v444_v43, %v572_v44  ;;  %v573_v50 = vld [vmem:[%s2202_s23 + $0x338] sm:$0xff] }
 0x11c   : > { %v1336_v39 = vmul.f32 0.5, %v1208_v28  ;;  %v1083_v42 = vmax.f32 %v827_v37, %v955_v38  ;;  %1463 = vst [vmem:[%s2244_s25 + $0x308] sm:$0xff] %v1335_v34  ;;  %v1210_v46 = vadd.f32 %v1082_v35, %v698_v30  ;;  %v956_v48 = vld [vmem:[%s2213_s1 + $0x330] sm:$0xff]  ;;  %v701_v54 = vmax.f32 %v445_v49, %v573_v50  ;;  %v829_v55 = vld [vmem:[%s2209_s7 + $0x338] sm:$0xff]  ;;  %v446_v57 = vld [vmem:[%s2194_s5 + $0x340] sm:$0xff] }
 0x11d   : > { %v1337_v51 = vmul.f32 0.5, %v1209_v40  ;;  %v1084_v53 = vmax.f32 %v828_v45, %v956_v48  ;;  %v957_v56 = vld [vmem:[%s2213_s1 + $0x338] sm:$0xff]  ;;  %v574_v60 = vld [vmem:[%s2202_s23 + $0x340] sm:$0xff]  ;;  %v447_v3 = vld [vmem:[%s2194_s5 + $0x348] sm:$0xff] }
 0x11e   : > { %1464 = vst [vmem:[%s2244_s25 + $0x310] sm:$0xff] %v1336_v39  ;;  %v1211_v52 = vadd.f32 %v1083_v42, %v699_v41  ;;  %v1338_v58 = vmul.f32 0.5, %v1210_v46  ;;  %v1085_v59 = vmax.f32 %v829_v55, %v957_v56  ;;  %v830_v61 = vld [vmem:[%s2209_s7 + $0x340] sm:$0xff]  ;;  %v702_v1 = vmax.f32 %v446_v57, %v574_v60  ;;  %v575_v4 = vld [vmem:[%s2202_s23 + $0x348] sm:$0xff]  ;;  %v448_v9 = vld [vmem:[%s2194_s5 + $0x350] sm:$0xff] }
 0x11f   : > { %v958_v62 = vld [vmem:[%s2213_s1 + $0x340] sm:$0xff]  ;;  %1465 = vst [vmem:[%s2244_s25 + $0x318] sm:$0xff] %v1337_v51  ;;  %v1212_v0 = vadd.f32 %v1084_v53, %v700_v47  ;;  %v831_v5 = vld [vmem:[%s2209_s7 + $0x348] sm:$0xff]  ;;  %v703_v7 = vmax.f32 %v447_v3, %v575_v4  ;;  %v576_v10 = vld [vmem:[%s2202_s23 + $0x350] sm:$0xff] }
 0x120   : > { %v1339_v63 = vmul.f32 0.5, %v1211_v52  ;;  %v1086_v2 = vmax.f32 %v830_v61, %v958_v62  ;;  %1466 = vst [vmem:[%s2244_s25 + $0x320] sm:$0xff] %v1338_v58  ;;  %v1213_v6 = vadd.f32 %v1085_v59, %v701_v54  ;;  %v959_v8 = vld [vmem:[%s2213_s1 + $0x348] sm:$0xff]  ;;  %v704_v14 = vmax.f32 %v448_v9, %v576_v10  ;;  %v832_v15 = vld [vmem:[%s2209_s7 + $0x350] sm:$0xff]  ;;  %v449_v17 = vld [vmem:[%s2194_s5 + $0x358] sm:$0xff] }
 0x121   : > { %v1340_v11 = vmul.f32 0.5, %v1212_v0  ;;  %v1087_v13 = vmax.f32 %v831_v5, %v959_v8  ;;  %v960_v16 = vld [vmem:[%s2213_s1 + $0x350] sm:$0xff]  ;;  %v577_v20 = vld [vmem:[%s2202_s23 + $0x358] sm:$0xff]  ;;  %v450_v27 = vld [vmem:[%s2194_s5 + $0x360] sm:$0xff] }
 0x122   : > { %1467 = vst [vmem:[%s2244_s25 + $0x328] sm:$0xff] %v1339_v63  ;;  %v1214_v12 = vadd.f32 %v1086_v2, %v702_v1  ;;  %v1341_v18 = vmul.f32 0.5, %v1213_v6  ;;  %v1088_v19 = vmax.f32 %v832_v15, %v960_v16  ;;  %v833_v21 = vld [vmem:[%s2209_s7 + $0x358] sm:$0xff]  ;;  %v705_v25 = vmax.f32 %v449_v17, %v577_v20  ;;  %v578_v28 = vld [vmem:[%s2202_s23 + $0x360] sm:$0xff]  ;;  %v451_v33 = vld [vmem:[%s2194_s5 + $0x368] sm:$0xff] }
 0x123   : > { %v961_v22 = vld [vmem:[%s2213_s1 + $0x358] sm:$0xff]  ;;  %1468 = vst [vmem:[%s2244_s25 + $0x330] sm:$0xff] %v1340_v11  ;;  %v1215_v24 = vadd.f32 %v1087_v13, %v703_v7  ;;  %v834_v29 = vld [vmem:[%s2209_s7 + $0x360] sm:$0xff]  ;;  %v706_v31 = vmax.f32 %v450_v27, %v578_v28  ;;  %v579_v34 = vld [vmem:[%s2202_s23 + $0x368] sm:$0xff] }
 0x124   : > { %v1342_v23 = vmul.f32 0.5, %v1214_v12  ;;  %v1089_v26 = vmax.f32 %v833_v21, %v961_v22  ;;  %1469 = vst [vmem:[%s2244_s25 + $0x338] sm:$0xff] %v1341_v18  ;;  %v1216_v30 = vadd.f32 %v1088_v19, %v704_v14  ;;  %v962_v32 = vld [vmem:[%s2213_s1 + $0x360] sm:$0xff]  ;;  %v707_v38 = vmax.f32 %v451_v33, %v579_v34  ;;  %v835_v39 = vld [vmem:[%s2209_s7 + $0x368] sm:$0xff]  ;;  %v452_v41 = vld [vmem:[%s2194_s5 + $0x370] sm:$0xff] }
 0x125   : > { %v1343_v35 = vmul.f32 0.5, %v1215_v24  ;;  %v1090_v37 = vmax.f32 %v834_v29, %v962_v32  ;;  %v963_v40 = vld [vmem:[%s2213_s1 + $0x368] sm:$0xff]  ;;  %v580_v44 = vld [vmem:[%s2202_s23 + $0x370] sm:$0xff]  ;;  %v453_v51 = vld [vmem:[%s2194_s5 + $0x378] sm:$0xff] }
 0x126   : > { %1470 = vst [vmem:[%s2244_s25 + $0x340] sm:$0xff] %v1342_v23  ;;  %v1217_v36 = vadd.f32 %v1089_v26, %v705_v25  ;;  %v1344_v42 = vmul.f32 0.5, %v1216_v30  ;;  %v1091_v43 = vmax.f32 %v835_v39, %v963_v40  ;;  %v836_v45 = vld [vmem:[%s2209_s7 + $0x370] sm:$0xff]  ;;  %v708_v49 = vmax.f32 %v452_v41, %v580_v44  ;;  %v581_v52 = vld [vmem:[%s2202_s23 + $0x378] sm:$0xff]  ;;  %v454_v57 = vld [vmem:[%s2194_s5 + $0x380] sm:$0xff] }
 0x127   : > { %v964_v46 = vld [vmem:[%s2213_s1 + $0x370] sm:$0xff]  ;;  %1471 = vst [vmem:[%s2244_s25 + $0x348] sm:$0xff] %v1343_v35  ;;  %v1218_v48 = vadd.f32 %v1090_v37, %v706_v31  ;;  %v837_v53 = vld [vmem:[%s2209_s7 + $0x378] sm:$0xff]  ;;  %v709_v55 = vmax.f32 %v453_v51, %v581_v52  ;;  %v582_v58 = vld [vmem:[%s2202_s23 + $0x380] sm:$0xff] }
 0x128   : > { %v1345_v47 = vmul.f32 0.5, %v1217_v36  ;;  %v1092_v50 = vmax.f32 %v836_v45, %v964_v46  ;;  %1472 = vst [vmem:[%s2244_s25 + $0x350] sm:$0xff] %v1344_v42  ;;  %v1219_v54 = vadd.f32 %v1091_v43, %v707_v38  ;;  %v965_v56 = vld [vmem:[%s2213_s1 + $0x378] sm:$0xff]  ;;  %v710_v62 = vmax.f32 %v454_v57, %v582_v58  ;;  %v838_v63 = vld [vmem:[%s2209_s7 + $0x380] sm:$0xff]  ;;  %v455_v1 = vld [vmem:[%s2194_s5 + $0x388] sm:$0xff] }
 0x129   : > { %v1346_v59 = vmul.f32 0.5, %v1218_v48  ;;  %v1093_v61 = vmax.f32 %v837_v53, %v965_v56  ;;  %v966_v0 = vld [vmem:[%s2213_s1 + $0x380] sm:$0xff]  ;;  %v583_v4 = vld [vmem:[%s2202_s23 + $0x388] sm:$0xff]  ;;  %v456_v11 = vld [vmem:[%s2194_s5 + $0x390] sm:$0xff] }
 0x12a   : > { %1473 = vst [vmem:[%s2244_s25 + $0x358] sm:$0xff] %v1345_v47  ;;  %v1220_v60 = vadd.f32 %v1092_v50, %v708_v49  ;;  %v1347_v2 = vmul.f32 0.5, %v1219_v54  ;;  %v1094_v3 = vmax.f32 %v838_v63, %v966_v0  ;;  %v839_v5 = vld [vmem:[%s2209_s7 + $0x388] sm:$0xff]  ;;  %v711_v9 = vmax.f32 %v455_v1, %v583_v4  ;;  %v584_v12 = vld [vmem:[%s2202_s23 + $0x390] sm:$0xff]  ;;  %v457_v17 = vld [vmem:[%s2194_s5 + $0x398] sm:$0xff] }
 0x12b   : > { %v967_v6 = vld [vmem:[%s2213_s1 + $0x388] sm:$0xff]  ;;  %1474 = vst [vmem:[%s2244_s25 + $0x360] sm:$0xff] %v1346_v59  ;;  %v1221_v8 = vadd.f32 %v1093_v61, %v709_v55  ;;  %v840_v13 = vld [vmem:[%s2209_s7 + $0x390] sm:$0xff]  ;;  %v712_v15 = vmax.f32 %v456_v11, %v584_v12  ;;  %v585_v18 = vld [vmem:[%s2202_s23 + $0x398] sm:$0xff] }
 0x12c   : > { %v1348_v7 = vmul.f32 0.5, %v1220_v60  ;;  %v1095_v10 = vmax.f32 %v839_v5, %v967_v6  ;;  %1475 = vst [vmem:[%s2244_s25 + $0x368] sm:$0xff] %v1347_v2  ;;  %v1222_v14 = vadd.f32 %v1094_v3, %v710_v62  ;;  %v968_v16 = vld [vmem:[%s2213_s1 + $0x390] sm:$0xff]  ;;  %v713_v22 = vmax.f32 %v457_v17, %v585_v18  ;;  %v841_v23 = vld [vmem:[%s2209_s7 + $0x398] sm:$0xff]  ;;  %v458_v25 = vld [vmem:[%s2194_s5 + $0x3a0] sm:$0xff] }
 0x12d   : > { %v1349_v19 = vmul.f32 0.5, %v1221_v8  ;;  %v1096_v21 = vmax.f32 %v840_v13, %v968_v16  ;;  %v969_v24 = vld [vmem:[%s2213_s1 + $0x398] sm:$0xff]  ;;  %v586_v28 = vld [vmem:[%s2202_s23 + $0x3a0] sm:$0xff]  ;;  %v459_v35 = vld [vmem:[%s2194_s5 + $0x3a8] sm:$0xff] }
 0x12e   : > { %1476 = vst [vmem:[%s2244_s25 + $0x370] sm:$0xff] %v1348_v7  ;;  %v1223_v20 = vadd.f32 %v1095_v10, %v711_v9  ;;  %v1350_v26 = vmul.f32 0.5, %v1222_v14  ;;  %v1097_v27 = vmax.f32 %v841_v23, %v969_v24  ;;  %v842_v29 = vld [vmem:[%s2209_s7 + $0x3a0] sm:$0xff]  ;;  %v714_v33 = vmax.f32 %v458_v25, %v586_v28  ;;  %v587_v36 = vld [vmem:[%s2202_s23 + $0x3a8] sm:$0xff]  ;;  %v460_v41 = vld [vmem:[%s2194_s5 + $0x3b0] sm:$0xff] }
 0x12f   : > { %v970_v30 = vld [vmem:[%s2213_s1 + $0x3a0] sm:$0xff]  ;;  %1477 = vst [vmem:[%s2244_s25 + $0x378] sm:$0xff] %v1349_v19  ;;  %v1224_v32 = vadd.f32 %v1096_v21, %v712_v15  ;;  %v843_v37 = vld [vmem:[%s2209_s7 + $0x3a8] sm:$0xff]  ;;  %v715_v39 = vmax.f32 %v459_v35, %v587_v36  ;;  %v588_v42 = vld [vmem:[%s2202_s23 + $0x3b0] sm:$0xff] }
 0x130   : > { %v1351_v31 = vmul.f32 0.5, %v1223_v20  ;;  %v1098_v34 = vmax.f32 %v842_v29, %v970_v30  ;;  %1478 = vst [vmem:[%s2244_s25 + $0x380] sm:$0xff] %v1350_v26  ;;  %v1225_v38 = vadd.f32 %v1097_v27, %v713_v22  ;;  %v971_v40 = vld [vmem:[%s2213_s1 + $0x3a8] sm:$0xff]  ;;  %v716_v46 = vmax.f32 %v460_v41, %v588_v42  ;;  %v844_v47 = vld [vmem:[%s2209_s7 + $0x3b0] sm:$0xff]  ;;  %v461_v49 = vld [vmem:[%s2194_s5 + $0x3b8] sm:$0xff] }
 0x131   : > { %v1352_v43 = vmul.f32 0.5, %v1224_v32  ;;  %v1099_v45 = vmax.f32 %v843_v37, %v971_v40  ;;  %v972_v48 = vld [vmem:[%s2213_s1 + $0x3b0] sm:$0xff]  ;;  %v589_v52 = vld [vmem:[%s2202_s23 + $0x3b8] sm:$0xff]  ;;  %v462_v59 = vld [vmem:[%s2194_s5 + $0x3c0] sm:$0xff] }
 0x132   : > { %1479 = vst [vmem:[%s2244_s25 + $0x388] sm:$0xff] %v1351_v31  ;;  %v1226_v44 = vadd.f32 %v1098_v34, %v714_v33  ;;  %v1353_v50 = vmul.f32 0.5, %v1225_v38  ;;  %v1100_v51 = vmax.f32 %v844_v47, %v972_v48  ;;  %v845_v53 = vld [vmem:[%s2209_s7 + $0x3b8] sm:$0xff]  ;;  %v717_v57 = vmax.f32 %v461_v49, %v589_v52  ;;  %v590_v60 = vld [vmem:[%s2202_s23 + $0x3c0] sm:$0xff]  ;;  %v463_v1 = vld [vmem:[%s2194_s5 + $0x3c8] sm:$0xff] }
 0x133   : > { %v973_v54 = vld [vmem:[%s2213_s1 + $0x3b8] sm:$0xff]  ;;  %1480 = vst [vmem:[%s2244_s25 + $0x390] sm:$0xff] %v1352_v43  ;;  %v1227_v56 = vadd.f32 %v1099_v45, %v715_v39  ;;  %v846_v61 = vld [vmem:[%s2209_s7 + $0x3c0] sm:$0xff]  ;;  %v718_v63 = vmax.f32 %v462_v59, %v590_v60  ;;  %v591_v2 = vld [vmem:[%s2202_s23 + $0x3c8] sm:$0xff] }
 0x134   : > { %v1354_v55 = vmul.f32 0.5, %v1226_v44  ;;  %v1101_v58 = vmax.f32 %v845_v53, %v973_v54  ;;  %1481 = vst [vmem:[%s2244_s25 + $0x398] sm:$0xff] %v1353_v50  ;;  %v1228_v62 = vadd.f32 %v1100_v51, %v716_v46  ;;  %v974_v0 = vld [vmem:[%s2213_s1 + $0x3c0] sm:$0xff]  ;;  %v719_v6 = vmax.f32 %v463_v1, %v591_v2  ;;  %v847_v7 = vld [vmem:[%s2209_s7 + $0x3c8] sm:$0xff]  ;;  %v464_v9 = vld [vmem:[%s2194_s5 + $0x3d0] sm:$0xff] }
 0x135   : > { %v1355_v3 = vmul.f32 0.5, %v1227_v56  ;;  %v1102_v5 = vmax.f32 %v846_v61, %v974_v0  ;;  %v975_v8 = vld [vmem:[%s2213_s1 + $0x3c8] sm:$0xff]  ;;  %v592_v12 = vld [vmem:[%s2202_s23 + $0x3d0] sm:$0xff]  ;;  %v465_v19 = vld [vmem:[%s2194_s5 + $0x3d8] sm:$0xff] }
 0x136   : > { %1482 = vst [vmem:[%s2244_s25 + $0x3a0] sm:$0xff] %v1354_v55  ;;  %v1229_v4 = vadd.f32 %v1101_v58, %v717_v57  ;;  %v1356_v10 = vmul.f32 0.5, %v1228_v62  ;;  %v1103_v11 = vmax.f32 %v847_v7, %v975_v8  ;;  %v848_v13 = vld [vmem:[%s2209_s7 + $0x3d0] sm:$0xff]  ;;  %v720_v17 = vmax.f32 %v464_v9, %v592_v12  ;;  %v593_v20 = vld [vmem:[%s2202_s23 + $0x3d8] sm:$0xff]  ;;  %v466_v25 = vld [vmem:[%s2194_s5 + $0x3e0] sm:$0xff] }
 0x137   : > { %v976_v14 = vld [vmem:[%s2213_s1 + $0x3d0] sm:$0xff]  ;;  %1483 = vst [vmem:[%s2244_s25 + $0x3a8] sm:$0xff] %v1355_v3  ;;  %v1230_v16 = vadd.f32 %v1102_v5, %v718_v63  ;;  %v849_v21 = vld [vmem:[%s2209_s7 + $0x3d8] sm:$0xff]  ;;  %v721_v23 = vmax.f32 %v465_v19, %v593_v20  ;;  %v594_v26 = vld [vmem:[%s2202_s23 + $0x3e0] sm:$0xff] }
 0x138   : > { %v1357_v15 = vmul.f32 0.5, %v1229_v4  ;;  %v1104_v18 = vmax.f32 %v848_v13, %v976_v14  ;;  %1484 = vst [vmem:[%s2244_s25 + $0x3b0] sm:$0xff] %v1356_v10  ;;  %v1231_v22 = vadd.f32 %v1103_v11, %v719_v6  ;;  %v977_v24 = vld [vmem:[%s2213_s1 + $0x3d8] sm:$0xff]  ;;  %v722_v30 = vmax.f32 %v466_v25, %v594_v26  ;;  %v850_v31 = vld [vmem:[%s2209_s7 + $0x3e0] sm:$0xff]  ;;  %v467_v33 = vld [vmem:[%s2194_s5 + $0x3e8] sm:$0xff] }
 0x139   : > { %v1358_v27 = vmul.f32 0.5, %v1230_v16  ;;  %v1105_v29 = vmax.f32 %v849_v21, %v977_v24  ;;  %v978_v32 = vld [vmem:[%s2213_s1 + $0x3e0] sm:$0xff]  ;;  %v595_v36 = vld [vmem:[%s2202_s23 + $0x3e8] sm:$0xff]  ;;  %v468_v43 = vld [vmem:[%s2194_s5 + $0x3f0] sm:$0xff] }
 0x13a   : > { %1485 = vst [vmem:[%s2244_s25 + $0x3b8] sm:$0xff] %v1357_v15  ;;  %v1232_v28 = vadd.f32 %v1104_v18, %v720_v17  ;;  %v1359_v34 = vmul.f32 0.5, %v1231_v22  ;;  %v1106_v35 = vmax.f32 %v850_v31, %v978_v32  ;;  %v851_v37 = vld [vmem:[%s2209_s7 + $0x3e8] sm:$0xff]  ;;  %v723_v41 = vmax.f32 %v467_v33, %v595_v36  ;;  %v596_v44 = vld [vmem:[%s2202_s23 + $0x3f0] sm:$0xff]  ;;  %v469_v49 = vld [vmem:[%s2194_s5 + $0x3f8] sm:$0xff] }
 0x13b   : > { %v979_v38 = vld [vmem:[%s2213_s1 + $0x3e8] sm:$0xff]  ;;  %1486 = vst [vmem:[%s2244_s25 + $0x3c0] sm:$0xff] %v1358_v27  ;;  %v1233_v40 = vadd.f32 %v1105_v29, %v721_v23  ;;  %v852_v45 = vld [vmem:[%s2209_s7 + $0x3f0] sm:$0xff]  ;;  %v724_v47 = vmax.f32 %v468_v43, %v596_v44  ;;  %v597_v50 = vld [vmem:[%s2202_s23 + $0x3f8] sm:$0xff] }
 0x13c   : > { %v1360_v39 = vmul.f32 0.5, %v1232_v28  ;;  %v1107_v42 = vmax.f32 %v851_v37, %v979_v38  ;;  %1487 = vst [vmem:[%s2244_s25 + $0x3c8] sm:$0xff] %v1359_v34  ;;  %v1234_v46 = vadd.f32 %v1106_v35, %v722_v30  ;;  %v980_v48 = vld [vmem:[%s2213_s1 + $0x3f0] sm:$0xff]  ;;  %v725_v54 = vmax.f32 %v469_v49, %v597_v50  ;;  %v853_v55 = vld [vmem:[%s2209_s7 + $0x3f8] sm:$0xff] }
 0x13d   : > { %v1361_v51 = vmul.f32 0.5, %v1233_v40  ;;  %v1108_v53 = vmax.f32 %v852_v45, %v980_v48  ;;  %v981_v56 = vld [vmem:[%s2213_s1 + $0x3f8] sm:$0xff] }
 0x13e   : > { %1488 = vst [vmem:[%s2244_s25 + $0x3d0] sm:$0xff] %v1360_v39  ;;  %v1235_v52 = vadd.f32 %v1107_v42, %v723_v41  ;;  %v1362_v57 = vmul.f32 0.5, %v1234_v46  ;;  %v1109_v58 = vmax.f32 %v853_v55, %v981_v56 }
 0x13f   : > { %1489 = vst [vmem:[%s2244_s25 + $0x3d8] sm:$0xff] %v1361_v51  ;;  %v1236_v60 = vadd.f32 %v1108_v53, %v724_v47 }
 0x140   : > { %v1363_v59 = vmul.f32 0.5, %v1235_v52  ;;  %1490 = vst [vmem:[%s2244_s25 + $0x3e0] sm:$0xff] %v1362_v57  ;;  %v1237_v61 = vadd.f32 %v1109_v58, %v725_v54 }
 0x141   : > { %v1364_v62 = vmul.f32 0.5, %v1236_v60 }
 0x142   : > { %1491 = vst [vmem:[%s2244_s25 + $0x3e8] sm:$0xff] %v1363_v59  ;;  %v1365_v63 = vmul.f32 0.5, %v1237_v61 }
 0x143   : > { %1492 = vst [vmem:[%s2244_s25 + $0x3f0] sm:$0xff] %v1364_v62 }
 0x144   : > { %1493 = vst [vmem:[%s2244_s25 + $0x3f8] sm:$0xff] %v1365_v63 }
 0x145   : > { %1879 = shalt.err (!%p1876_p0)
}
 0x146   : > { %s1880_s24 = scalar_lea.hbm %s2865_s8, 16384  ;;  %s1884_s17 = scalar_lea.hbm %s2916_s4, 32768 }
 0x147   : > { %p1881_p11 = scmp.ne.s32.totalorder %s2865_s8, %s1880_s24  ;;  %p1885_p7 = scmp.lt.s32.totalorder %s2865_s8, %s2916_s4 }
 0x148   : > { %p1886_p2 = scmp.lt.s32.totalorder %s1884_s17, %s1880_s24 }
 0x149   : > { %p1882_p4 = pnand %p1881_p11, %p2944_p10 }
 0x14a   : > { %p1887_p8 = por %p1886_p2, %p1885_p7 }
 0x14b   : > { %p1883_p5 = pneg %p1882_p4 }
 0x14d   : > { %p1888_p13 = pnand %p1887_p8, %p1883_p5 }
 0x14f   : > { %1891 = shalt.err (!%p1888_p13)
}
 0x150   : > { %s1947_s13 = smov 512   ;;  %s1948_s23 = smov 32  }
 0x151   : > { %1697 = dma.vmem_to_hbm [thread:$0]  (%p2944_p10), %s2867_s22, 16384, %s2865_s8, %s1495_s19, %s1947_s13, %s1947_s13, %s1948_s23  }
 0x152 PF: > { %s1524_s7 = sand.u32 1, %s1926_s15   ;;  %p2945_p1 = scmp.ne.s32.totalorder %s2933_s27, 0 }
 0x153   : > { %p2946_p3 = scmp.ge.s32.totalorder %s1938_s18, 2  ;;  %s1525_s21 = scalar_lea.sflag [#allocation4], %s1524_s7 }
 0x155   : > { %p1713_p9 = pnand %p2946_p3, %p2945_p1 }
 0x157   : > { %p1714_p6 = pneg %p1713_p9 }
 0x159   : > { %1921 = dma.done.wait (%p1714_p6), %s1525_s21, 16384  }
 0x15a   : > { %1923 = vsyncadd (%p1714_p6), %s1525_s21, 4294950912  ;;  %s2947_s18 = sld [smem:[#allocation16_spill]]  ;;  %s2950_s15 = smov %s1930_s16 }
 0x15b   : > { %s2948_s1 = sld [smem:[#allocation15_spill]] }
 0x15c   : > { %s2949_s17 = sld [smem:[#allocation17_spill]] }
 0x160   : > { %p23_p12 = scmp.ge.s32.totalorder %s2947_s18, 4  }
 0x161   : > { %s2951_s16 = smov %s2948_s1 }
 0x162   :  { %25 = sbr.rel (!%p23_p12) target bundleno = 12 (0xc), region = 118 }
 0x167   :  { %1530 = vsyncpa [#allocation3], 1 }
 0x168   :  { %1532 = vsyncpa [#allocation3 + $0x1], 1 }
 0x169   :  { %1533 = vsyncpa [#allocation6], 1 }
 0x16a   :  { %1535 = vsyncpa [#allocation6 + $0x1], 1 }
 0x16b   :  { %1536 = vsyncpa [#allocation9], 1 }
 0x16c   :  { %1538 = vsyncpa [#allocation9 + $0x1], 1 }
 0x16d   :  { %1539 = vsyncpa [#allocation4], 1 }
 0x16e   :  { %1541 = vsyncpa [#allocation4 + $0x1], 1 }

</bundles_post_ra>
